<compile_context>
chip_gen: v6e
topology: v6e:2x2x1
jax: 0.10.0
libtpu: 0.0.40
codegen_flags: <defaults>
</compile_context>

<pallas_src>
import functools

import jax
import jax.numpy as jnp
import numpy as np
from jax.experimental import pallas as pl
from jax.experimental.pallas import tpu as pltpu

LANE = 128


def _round_up(n, m):
    return (n + m - 1) // m * m


# ---------------------------------------------------------------------------
# Kernel A: row-tiled fused  out = relu(X @ W + b)   (bf16 in, f32 accumulate)
# Used for conv_1 / conv_2 on im2col'd activations.
# ---------------------------------------------------------------------------
def _fused_matmul_relu_kernel(x_ref, w_ref, b_ref, o_ref):
    acc = jnp.dot(x_ref[...], w_ref[...], preferred_element_type=jnp.float32)
    o_ref[...] = jnp.maximum(acc + b_ref[...], 0.0).astype(o_ref.dtype)


def fused_matmul_relu(x, w, b, out_dtype=jnp.bfloat16, max_tile_m=1024):
    """x: (M, K) bf16, w: (K, N) bf16, b: (1, N) f32.  N is lane-padded."""
    M, K = x.shape
    N = w.shape[1]
    # Always give the grid >= 2 steps when possible (both TCs busy on v7x).
    tm = min(max_tile_m, max(8, _round_up(pl.cdiv(M, 2), 8)))
    tm = min(tm, _round_up(M, 8))
    return pl.pallas_call(
        _fused_matmul_relu_kernel,
        out_shape=jax.ShapeDtypeStruct((M, N), out_dtype),
        grid=(pl.cdiv(M, tm),),
        in_specs=[
            pl.BlockSpec((tm, K), lambda i: (i, 0)),
            pl.BlockSpec((K, N), lambda i: (0, 0)),
            pl.BlockSpec((1, N), lambda i: (0, 0)),
        ],
        out_specs=pl.BlockSpec((tm, N), lambda i: (i, 0)),
        compiler_params=pltpu.CompilerParams(
            dimension_semantics=("parallel",),
            vmem_limit_bytes=32 * 1024 * 1024),
    )(x, w, b)


# ---------------------------------------------------------------------------
# Kernel B: conv_3 (3x3, bias, no act) + full ResidualStack, VMEM-resident.
#
# Activations live in a flattened zero-bordered bf16 frame:
#   frame row (lead + hp_idx*Wp + wp_idx) holds padded-image pixel (hp_idx, wp_idx),
#   Wp = OW + 2, and `lead` is chosen so the interior write offset is 8-aligned.
# A 3x3 / stride-1 / pad-1 conv is then ONE deep-K matmul on the concatenation of
# 9 shifted contiguous row slabs (in-VMEM im2col):
#   out = concat_t frame[delta_t : delta_t+acc_rows]  @  W_flat ,
#   delta_t = lead + kh*Wp + kw,  W_flat = (9*C, Cout).
# Junk accumulator rows (padding columns / round-up) are zeroed by a mask before
# being written back into the frame so the borders stay exactly zero.
# ---------------------------------------------------------------------------
def _make_tail_kernel(num_res_layers, deltas, acc_rows, write_off,
                      tail_zero_rows):
    def kernel(x_ref, w3_ref, b3_ref, rw3_ref, rw1_ref, mask_ref, o_ref,
               frame_ref):
        cols = frame_ref.shape[1]

        def conv3x3(src_ref, w_flat):
            slab = jnp.concatenate(
                [src_ref[pl.ds(d, acc_rows), :] for d in deltas], axis=1)
            return jnp.dot(slab, w_flat, preferred_element_type=jnp.float32)

        # conv_3 : 3x3 / s1 / p1, + bias, no activation.  f32 accumulator h.
        h = conv3x3(x_ref, w3_ref[...]) + b3_ref[...]

        # Zero only the frame border rows (interior is fully overwritten each
        # layer).  Done every grid step -> correct under megacore partitioning.
        frame_ref[pl.ds(0, write_off), :] = jnp.zeros(
            (write_off, cols), frame_ref.dtype)
        if tail_zero_rows > 0:
            frame_ref[pl.ds(write_off + acc_rows, tail_zero_rows), :] = (
                jnp.zeros((tail_zero_rows, cols), frame_ref.dtype))

        mask = mask_ref[...]                                     # (acc_rows, C)

        # Residual stack: x = x + Conv1x1(ReLU(Conv3x3(ReLU(x)))), final ReLU.
        for i in range(num_res_layers):
            frame_ref[pl.ds(write_off, acc_rows), :] = (
                jnp.maximum(h, 0.0) * mask).astype(frame_ref.dtype)
            hid = conv3x3(frame_ref, rw3_ref[i])
            hid = jnp.maximum(hid, 0.0).astype(jnp.bfloat16)
            h = h + jnp.dot(hid, rw1_ref[i],
                            preferred_element_type=jnp.float32)

        # Final ReLU; junk rows / padded lanes are dropped by the wrapper slice.
        o_ref[...] = jnp.maximum(h, 0.0).astype(o_ref.dtype)

    return kernel


def encoder_tail(x_nhwc, p, num_residual_layers):
    """x_nhwc: (N, OH, OW, C2p) bf16 (conv_2 output, channels lane-padded)."""
    n, oh, ow, c = x_nhwc.shape
    wp, hp = ow + 2, oh + 2
    lead = (-(wp + 1)) % 8            # makes write_off a multiple of 8
    write_off = lead + wp + 1         # frame row of output pixel (0, 0)
    acc_rows = _round_up(oh * wp, 8)
    deltas = tuple(lead + kh * wp + kw for kh in range(3) for kw in range(3))
    frame_rows = _round_up(max(deltas[-1] + acc_rows, lead + hp * wp), 8)
    tail_zero_rows = frame_rows - write_off - acc_rows

    # Build the flattened zero-bordered input frame (bf16).
    xf = jnp.pad(x_nhwc, ((0, 0), (1, 1), (1, 1), (0, 0)))
    xf = xf.reshape(n, hp * wp, c)
    xf = jnp.pad(xf, ((0, 0), (lead, frame_rows - lead - hp * wp), (0, 0)))

    # Validity mask over accumulator rows p = h*Wp + w (bf16, fetched once).
    pidx = np.arange(acc_rows)
    valid = ((pidx // wp) < oh) & ((pidx % wp) < ow)
    mask = jnp.asarray(
        np.repeat(valid[:, None].astype(np.float32), c, axis=1)
    ).astype(jnp.bfloat16)

    L = num_residual_layers
    cr = p["rw1"].shape[1]
    kernel = _make_tail_kernel(L, deltas, acc_rows, write_off, tail_zero_rows)

    return pl.pallas_call(
        kernel,
        out_shape=jax.ShapeDtypeStruct((n, acc_rows, c), jnp.bfloat16),
        grid=(n,),
        in_specs=[
            pl.BlockSpec((None, frame_rows, c), lambda b: (b, 0, 0)),
            pl.BlockSpec((9 * c, c), lambda b: (0, 0)),
            pl.BlockSpec((1, c), lambda b: (0, 0)),
            pl.BlockSpec((L, 9 * c, cr), lambda b: (0, 0, 0)),
            pl.BlockSpec((L, cr, c), lambda b: (0, 0, 0)),
            pl.BlockSpec((acc_rows, c), lambda b: (0, 0)),
        ],
        out_specs=pl.BlockSpec((None, acc_rows, c), lambda b: (b, 0, 0)),
        scratch_shapes=[pltpu.VMEM((frame_rows, c), jnp.bfloat16)],
        compiler_params=pltpu.CompilerParams(
            dimension_semantics=("parallel",),
            vmem_limit_bytes=32 * 1024 * 1024),
    )(xf, p["w3f"], p["b3p"], p["rw3"], p["rw1"], mask)


# ---------------------------------------------------------------------------
# JAX glue: im2col for the two stride-2 convs only (pad / gather / reshape).
# ---------------------------------------------------------------------------
def im2col(x, k, stride, pad):
    n, h, w, c = x.shape
    xp = jnp.pad(x, ((0, 0), (pad, pad), (pad, pad), (0, 0)))
    oh = (h + 2 * pad - k) // stride + 1
    ow = (w + 2 * pad - k) // stride + 1
    patches = []
    for kh in range(k):
        for kw in range(k):
            patches.append(
                xp[:, kh:kh + stride * (oh - 1) + 1:stride,
                      kw:kw + stride * (ow - 1) + 1:stride, :])
    cols = jnp.stack(patches, axis=3).reshape(n * oh * ow, k * k * c)
    return cols, oh, ow


# ---------------------------------------------------------------------------
# Parameter prep: pad only the dims that need lane padding, flatten, cast bf16.
# Done ONCE, outside the forward pass.
# ---------------------------------------------------------------------------
def prepare_padded_params(params):
    w1, b1 = params["w1"], params["b1"]
    w2, b2 = params["w2"], params["b2"]
    w3, b3 = params["w3"], params["b3"]
    cin = w1.shape[2]
    c1, c2 = w1.shape[3], w2.shape[3]
    cr = params["res_w3"][0].shape[3]
    c1p, c2p, crp = (_round_up(c, LANE) for c in (c1, c2, cr))

    def bias_pad(b, cp):
        return jnp.pad(b, (0, cp - b.shape[0])).reshape(1, cp).astype(jnp.float32)

    # conv_1: K = 16*cin (unpadded K); pad only output channels.
    w1f = jnp.pad(w1.reshape(16 * cin, c1),
                  ((0, 0), (0, c1p - c1))).astype(jnp.bfloat16)
    # conv_2: K = 16*c1 (real input channels); pad only output channels.
    w2f = jnp.pad(w2, ((0, 0), (0, 0), (0, 0), (0, c2p - c2))
                  ).reshape(16 * c1, c2p).astype(jnp.bfloat16)
    # conv_3 and residual 3x3 convs flattened tap-major for the deep-K matmul.
    w3f = jnp.pad(w3, ((0, 0), (0, 0), (0, c2p - c2), (0, c2p - c2))
                  ).reshape(9 * c2p, c2p).astype(jnp.bfloat16)
    rw3 = jnp.stack([
        jnp.pad(w, ((0, 0), (0, 0), (0, c2p - c2), (0, crp - cr))
                ).reshape(9 * c2p, crp)
        for w in params["res_w3"]]).astype(jnp.bfloat16)
    rw1 = jnp.stack([
        jnp.pad(w, ((0, 0), (0, 0), (0, crp - cr), (0, c2p - c2))
                ).reshape(crp, c2p)
        for w in params["res_w1"]]).astype(jnp.bfloat16)

    return {
        "w1f": w1f, "b1p": bias_pad(b1, c1p),
        "w2f": w2f, "b2p": bias_pad(b2, c2p),
        "w3f": w3f, "b3p": bias_pad(b3, c2p),
        "rw3": rw3, "rw1": rw1,
    }


# ---------------------------------------------------------------------------
# Encoder forward (Pallas hot path): 3 pallas_call's total.
# num_hiddens / num_residual_layers are STATIC Python ints (bound via partial).
# ---------------------------------------------------------------------------
def encoder_forward(x_nchw, p, *, num_hiddens, num_residual_layers):
    c1 = num_hiddens // 2
    x = jnp.transpose(x_nchw, (0, 2, 3, 1)).astype(jnp.bfloat16)  # NCHW -> NHWC
    n = x.shape[0]

    # conv_1 (4x4 / s2 / p1) + ReLU  (K = 16*cin, unpadded)
    cols, oh, ow = im2col(x, 4, 2, 1)
    x = fused_matmul_relu(cols, p["w1f"], p["b1p"]).reshape(n, oh, ow, -1)

    # conv_2 (4x4 / s2 / p1) + ReLU  (slice back to real channels: K = 16*c1)
    cols, oh, ow = im2col(x[..., :c1], 4, 2, 1)
    x = fused_matmul_relu(cols, p["w2f"], p["b2p"]).reshape(n, oh, ow, -1)

    # conv_3 + full ResidualStack in one VMEM-resident kernel.
    out_p = encoder_tail(x, p, num_residual_layers)   # (n, acc_rows, C2p) bf16

    # Unpack flattened-frame rows -> NHWC, drop junk cols / padded lanes, NCHW.
    wp = ow + 2
    out = out_p[:, :oh * wp, :].reshape(n, oh, wp, -1)[:, :, :ow, :num_hiddens]
    return jnp.transpose(out, (0, 3, 1, 2)).astype(jnp.float32)


# ---------------------------------------------------------------------------
# Pure-JAX reference (mirrors the kernel's bf16-operand / f32-accum scheme).
# ---------------------------------------------------------------------------
def _conv_ref(x_bf16, w, b, stride, pad):
    out = jax.lax.conv_general_dilated(
        x_bf16, w.astype(jnp.bfloat16), (stride, stride),
        [(pad, pad), (pad, pad)],
        dimension_numbers=("NHWC", "HWIO", "NHWC"),
        preferred_element_type=jnp.float32)
    if b is not None:
        out = out + b
    return out


def encoder_ref(x_nchw, params, num_residual_layers):
    x = jnp.transpose(x_nchw, (0, 2, 3, 1)).astype(jnp.bfloat16)
    h = jax.nn.relu(_conv_ref(x, params["w1"], params["b1"], 2, 1)).astype(jnp.bfloat16)
    h = jax.nn.relu(_conv_ref(h, params["w2"], params["b2"], 2, 1)).astype(jnp.bfloat16)
    h = _conv_ref(h, params["w3"], params["b3"], 1, 1)  # f32, no activation
    for i in range(num_residual_layers):
        f = jax.nn.relu(h).astype(jnp.bfloat16)
        hid = jax.nn.relu(_conv_ref(f, params["res_w3"][i], None, 1, 1))
        hid = hid.astype(jnp.bfloat16)
        h = h + _conv_ref(hid, params["res_w1"][i], None, 1, 0)
    h = jax.nn.relu(h)
    return jnp.transpose(h, (0, 3, 1, 2))


# ---------------------------------------------------------------------------
# Deterministic synthetic parameters (shapes from Encoder.__init__)
# ---------------------------------------------------------------------------
def init_params(key, in_channels, num_hiddens, num_residual_layers,
                num_residual_hiddens):
    keys = jax.random.split(key, 6 + 2 * num_residual_layers)
    nh2 = num_hiddens // 2
    s = 0.05
    params = {
        "w1": s * jax.random.normal(keys[0], (4, 4, in_channels, nh2), jnp.float32),
        "b1": s * jax.random.normal(keys[1], (nh2,), jnp.float32),
        "w2": s * jax.random.normal(keys[2], (4, 4, nh2, num_hiddens), jnp.float32),
        "b2": s * jax.random.normal(keys[3], (num_hiddens,), jnp.float32),
        "w3": s * jax.random.normal(keys[4], (3, 3, num_hiddens, num_hiddens), jnp.float32),
        "b3": s * jax.random.normal(keys[5], (num_hiddens,), jnp.float32),
        "res_w3": [],
        "res_w1": [],
    }
    for i in range(num_residual_layers):
        params["res_w3"].append(
            s * jax.random.normal(keys[6 + 2 * i],
                                  (3, 3, num_hiddens, num_residual_hiddens),
                                  jnp.float32))
        params["res_w1"].append(
            s * jax.random.normal(keys[7 + 2 * i],
                                  (1, 1, num_residual_hiddens, num_hiddens),
                                  jnp.float32))
    return params


if __name__ == "__main__":
    batch, in_channels, H, W = 2, 3, 16, 16
    num_hiddens, num_residual_layers, num_residual_hiddens = 32, 2, 16

    key = jax.random.PRNGKey(0)
    kx, kp = jax.random.split(key)
    x = jax.random.normal(kx, (batch, in_channels, H, W), jnp.float32)  # NCHW
    params = init_params(kp, in_channels, num_hiddens, num_residual_layers,
                         num_residual_hiddens)
    padded = prepare_padded_params(params)

    fwd = jax.jit(functools.partial(encoder_forward,
                                    num_hiddens=num_hiddens,
                                    num_residual_layers=num_residual_layers))
    out = jax.block_until_ready(fwd(x, padded))

    ref = jax.block_until_ready(encoder_ref(x, params, num_residual_layers))
    np.testing.assert_allclose(np.asarray(out, dtype=np.float32),
                               np.asarray(ref, dtype=np.float32),
                               rtol=5e-3, atol=2e-3)

    assert out.shape == (batch, num_hiddens, H // 4, W // 4)
    print("KERNEL_OK")
</pallas_src>

<mosaic_0001>
module attributes {stable_mosaic.version = 11 : i64} {
  func.func @_fused_matmul_relu_kernel(%arg0: i32, %arg1: memref<64x48xbf16, #tpu.memory_space<vmem>>, %arg2: memref<48x128xbf16, #tpu.memory_space<vmem>>, %arg3: memref<1x128xf32, #tpu.memory_space<vmem>>, %arg4: memref<64x128xbf16, #tpu.memory_space<vmem>>) attributes {dimension_semantics = [#tpu.dimension_semantics<parallel>], iteration_bounds = array<i64: 2>, scalar_prefetch = 0 : i64, scratch_operands = 0 : i64, tpu.core_type = #tpu.core_type<tc>, window_params = [{transform_indices = @transform_0, window_bounds = array<i64: 64, 48>}, {pipeline_mode = #tpu.pipeline_mode<synchronous>, transform_indices = @transform_1, window_bounds = array<i64: 48, 128>}, {pipeline_mode = #tpu.pipeline_mode<synchronous>, transform_indices = @transform_2, window_bounds = array<i64: 1, 128>}, {transform_indices = @transform_3, window_bounds = array<i64: 64, 128>}]} {
    %c0 = arith.constant 0 : index
    %c0_0 = arith.constant 0 : index
    %0 = vector.load %arg1[%c0, %c0_0] : memref<64x48xbf16, #tpu.memory_space<vmem>>, vector<64x48xbf16>
    %c0_1 = arith.constant 0 : index
    %c0_2 = arith.constant 0 : index
    %1 = vector.load %arg2[%c0_1, %c0_2] : memref<48x128xbf16, #tpu.memory_space<vmem>>, vector<48x128xbf16>
    %cst = arith.constant dense<0.000000e+00> : vector<64x128xf32>
    %2 = tpu.matmul %0, %1, %cst {dimension_numbers = #tpu.dot_dimension_numbers<[1], [0], [0], [1], [0, 0, 1, 1], [], []>} : vector<64x48xbf16>, vector<48x128xbf16>, vector<64x128xf32> -> vector<64x128xf32>
    %c0_3 = arith.constant 0 : index
    %c0_4 = arith.constant 0 : index
    %3 = vector.load %arg3[%c0_3, %c0_4] : memref<1x128xf32, #tpu.memory_space<vmem>>, vector<1x128xf32>
    %4 = vector.broadcast %3 : vector<1x128xf32> to vector<64x128xf32>
    %5 = arith.addf %2, %4 : vector<64x128xf32>
    %cst_5 = arith.constant 0.000000e+00 : f32
    %6 = vector.broadcast %cst_5 : f32 to vector<64x128xf32>
    %7 = arith.maximumf %5, %6 : vector<64x128xf32>
    %8 = arith.truncf %7 : vector<64x128xf32> to vector<64x128xbf16>
    %c0_6 = arith.constant 0 : index
    %c0_7 = arith.constant 0 : index
    %9 = vector.load %arg4[%c0_6, %c0_7] : memref<64x128xbf16, #tpu.memory_space<vmem>>, vector<64x128xbf16>
    tpu.vector_store %arg4[%c0_6, %c0_7], %8 {strides = array<i32>} : memref<64x128xbf16, #tpu.memory_space<vmem>>, vector<64x128xbf16>,
    return
  }
  func.func @transform_0(%arg0: i32) -> (i32, i32) {
    %c0_i32 = arith.constant 0 : i32
    %c0_i32_0 = arith.constant 0 : i32
    return %arg0, %c0_i32 : i32, i32
  }
  func.func @transform_1(%arg0: i32) -> (i32, i32) {
    %c0_i32 = arith.constant 0 : i32
    %c0_i32_0 = arith.constant 0 : i32
    %c0_i32_1 = arith.constant 0 : i32
    return %c0_i32, %c0_i32_0 : i32, i32
  }
  func.func @transform_2(%arg0: i32) -> (i32, i32) {
    %c0_i32 = arith.constant 0 : i32
    %c0_i32_0 = arith.constant 0 : i32
    %c0_i32_1 = arith.constant 0 : i32
    return %c0_i32, %c0_i32_0 : i32, i32
  }
  func.func @transform_3(%arg0: i32) -> (i32, i32) {
    %c0_i32 = arith.constant 0 : i32
    %c0_i32_0 = arith.constant 0 : i32
    return %arg0, %c0_i32 : i32, i32
  }
}

module attributes {stable_mosaic.version = 11 : i64} {
  func.func @_fused_matmul_relu_kernel(%arg0: i32, %arg1: memref<16x256xbf16, #tpu.memory_space<vmem>>, %arg2: memref<256x128xbf16, #tpu.memory_space<vmem>>, %arg3: memref<1x128xf32, #tpu.memory_space<vmem>>, %arg4: memref<16x128xbf16, #tpu.memory_space<vmem>>) attributes {dimension_semantics = [#tpu.dimension_semantics<parallel>], iteration_bounds = array<i64: 2>, scalar_prefetch = 0 : i64, scratch_operands = 0 : i64, tpu.core_type = #tpu.core_type<tc>, window_params = [{transform_indices = @transform_0, window_bounds = array<i64: 16, 256>}, {pipeline_mode = #tpu.pipeline_mode<synchronous>, transform_indices = @transform_1, window_bounds = array<i64: 256, 128>}, {pipeline_mode = #tpu.pipeline_mode<synchronous>, transform_indices = @transform_2, window_bounds = array<i64: 1, 128>}, {transform_indices = @transform_3, window_bounds = array<i64: 16, 128>}]} {
    %c0 = arith.constant 0 : index
    %c0_0 = arith.constant 0 : index
    %0 = vector.load %arg1[%c0, %c0_0] : memref<16x256xbf16, #tpu.memory_space<vmem>>, vector<16x256xbf16>
    %c0_1 = arith.constant 0 : index
    %c0_2 = arith.constant 0 : index
    %1 = vector.load %arg2[%c0_1, %c0_2] : memref<256x128xbf16, #tpu.memory_space<vmem>>, vector<256x128xbf16>
    %cst = arith.constant dense<0.000000e+00> : vector<16x128xf32>
    %2 = tpu.matmul %0, %1, %cst {dimension_numbers = #tpu.dot_dimension_numbers<[1], [0], [0], [1], [0, 0, 1, 1], [], []>} : vector<16x256xbf16>, vector<256x128xbf16>, vector<16x128xf32> -> vector<16x128xf32>
    %c0_3 = arith.constant 0 : index
    %c0_4 = arith.constant 0 : index
    %3 = vector.load %arg3[%c0_3, %c0_4] : memref<1x128xf32, #tpu.memory_space<vmem>>, vector<1x128xf32>
    %4 = vector.broadcast %3 : vector<1x128xf32> to vector<16x128xf32>
    %5 = arith.addf %2, %4 : vector<16x128xf32>
    %cst_5 = arith.constant 0.000000e+00 : f32
    %6 = vector.broadcast %cst_5 : f32 to vector<16x128xf32>
    %7 = arith.maximumf %5, %6 : vector<16x128xf32>
    %8 = arith.truncf %7 : vector<16x128xf32> to vector<16x128xbf16>
    %c0_6 = arith.constant 0 : index
    %c0_7 = arith.constant 0 : index
    %9 = vector.load %arg4[%c0_6, %c0_7] : memref<16x128xbf16, #tpu.memory_space<vmem>>, vector<16x128xbf16>
    tpu.vector_store %arg4[%c0_6, %c0_7], %8 {strides = array<i32>} : memref<16x128xbf16, #tpu.memory_space<vmem>>, vector<16x128xbf16>,
    return
  }
  func.func @transform_0(%arg0: i32) -> (i32, i32) {
    %c0_i32 = arith.constant 0 : i32
    %c0_i32_0 = arith.constant 0 : i32
    return %arg0, %c0_i32 : i32, i32
  }
  func.func @transform_1(%arg0: i32) -> (i32, i32) {
    %c0_i32 = arith.constant 0 : i32
    %c0_i32_0 = arith.constant 0 : i32
    %c0_i32_1 = arith.constant 0 : i32
    return %c0_i32, %c0_i32_0 : i32, i32
  }
  func.func @transform_2(%arg0: i32) -> (i32, i32) {
    %c0_i32 = arith.constant 0 : i32
    %c0_i32_0 = arith.constant 0 : i32
    %c0_i32_1 = arith.constant 0 : i32
    return %c0_i32, %c0_i32_0 : i32, i32
  }
  func.func @transform_3(%arg0: i32) -> (i32, i32) {
    %c0_i32 = arith.constant 0 : i32
    %c0_i32_0 = arith.constant 0 : i32
    return %arg0, %c0_i32 : i32, i32
  }
}

module attributes {stable_mosaic.version = 11 : i64} {
  func.func @kernel(%arg0: i32, %arg1: memref<1x40x128xbf16, #tpu.memory_space<vmem>>, %arg2: memref<1152x128xbf16, #tpu.memory_space<vmem>>, %arg3: memref<1x128xf32, #tpu.memory_space<vmem>>, %arg4: memref<2x1152x128xbf16, #tpu.memory_space<vmem>>, %arg5: memref<2x128x128xbf16, #tpu.memory_space<vmem>>, %arg6: memref<24x128xbf16, #tpu.memory_space<vmem>>, %arg7: memref<1x24x128xbf16, #tpu.memory_space<vmem>>, %arg8: memref<40x128xbf16, #tpu.memory_space<vmem>>) attributes {dimension_semantics = [#tpu.dimension_semantics<parallel>], iteration_bounds = array<i64: 2>, scalar_prefetch = 0 : i64, scratch_operands = 1 : i64, tpu.core_type = #tpu.core_type<tc>, window_params = [{transform_indices = @transform_0, window_bounds = array<i64: 1, 40, 128>}, {pipeline_mode = #tpu.pipeline_mode<synchronous>, transform_indices = @transform_1, window_bounds = array<i64: 1152, 128>}, {pipeline_mode = #tpu.pipeline_mode<synchronous>, transform_indices = @transform_2, window_bounds = array<i64: 1, 128>}, {pipeline_mode = #tpu.pipeline_mode<synchronous>, transform_indices = @transform_3, window_bounds = array<i64: 2, 1152, 128>}, {pipeline_mode = #tpu.pipeline_mode<synchronous>, transform_indices = @transform_4, window_bounds = array<i64: 2, 128, 128>}, {pipeline_mode = #tpu.pipeline_mode<synchronous>, transform_indices = @transform_5, window_bounds = array<i64: 24, 128>}, {transform_indices = @transform_6, window_bounds = array<i64: 1, 24, 128>}]} {
    %c0 = arith.constant 0 : index
    %c0_0 = arith.constant 0 : index
    %0 = vector.load %arg2[%c0, %c0_0] : memref<1152x128xbf16, #tpu.memory_space<vmem>>, vector<1152x128xbf16>
    %c0_1 = arith.constant 0 : index
    %c1 = arith.constant 1 : index
    %c0_2 = arith.constant 0 : index
    %1 = vector.load %arg1[%c0_1, %c1, %c0_2] : memref<1x40x128xbf16, #tpu.memory_space<vmem>>, vector<1x24x128xbf16>
    %2 = vector.shape_cast %1 : vector<1x24x128xbf16> to vector<24x128xbf16>
    %c0_3 = arith.constant 0 : index
    %c2 = arith.constant 2 : index
    %c0_4 = arith.constant 0 : index
    %3 = vector.load %arg1[%c0_3, %c2, %c0_4] : memref<1x40x128xbf16, #tpu.memory_space<vmem>>, vector<1x24x128xbf16>
    %4 = vector.shape_cast %3 : vector<1x24x128xbf16> to vector<24x128xbf16>
    %c0_5 = arith.constant 0 : index
    %c3 = arith.constant 3 : index
    %c0_6 = arith.constant 0 : index
    %5 = vector.load %arg1[%c0_5, %c3, %c0_6] : memref<1x40x128xbf16, #tpu.memory_space<vmem>>, vector<1x24x128xbf16>
    %6 = vector.shape_cast %5 : vector<1x24x128xbf16> to vector<24x128xbf16>
    %c0_7 = arith.constant 0 : index
    %c7 = arith.constant 7 : index
    %c0_8 = arith.constant 0 : index
    %7 = vector.load %arg1[%c0_7, %c7, %c0_8] : memref<1x40x128xbf16, #tpu.memory_space<vmem>>, vector<1x24x128xbf16>
    %8 = vector.shape_cast %7 : vector<1x24x128xbf16> to vector<24x128xbf16>
    %c0_9 = arith.constant 0 : index
    %c8 = arith.constant 8 : index
    %c0_10 = arith.constant 0 : index
    %9 = vector.load %arg1[%c0_9, %c8, %c0_10] : memref<1x40x128xbf16, #tpu.memory_space<vmem>>, vector<1x24x128xbf16>
    %10 = vector.shape_cast %9 : vector<1x24x128xbf16> to vector<24x128xbf16>
    %c0_11 = arith.constant 0 : index
    %c9 = arith.constant 9 : index
    %c0_12 = arith.constant 0 : index
    %11 = vector.load %arg1[%c0_11, %c9, %c0_12] : memref<1x40x128xbf16, #tpu.memory_space<vmem>>, vector<1x24x128xbf16>
    %12 = vector.shape_cast %11 : vector<1x24x128xbf16> to vector<24x128xbf16>
    %c0_13 = arith.constant 0 : index
    %c13 = arith.constant 13 : index
    %c0_14 = arith.constant 0 : index
    %13 = vector.load %arg1[%c0_13, %c13, %c0_14] : memref<1x40x128xbf16, #tpu.memory_space<vmem>>, vector<1x24x128xbf16>
    %14 = vector.shape_cast %13 : vector<1x24x128xbf16> to vector<24x128xbf16>
    %c0_15 = arith.constant 0 : index
    %c14 = arith.constant 14 : index
    %c0_16 = arith.constant 0 : index
    %15 = vector.load %arg1[%c0_15, %c14, %c0_16] : memref<1x40x128xbf16, #tpu.memory_space<vmem>>, vector<1x24x128xbf16>
    %16 = vector.shape_cast %15 : vector<1x24x128xbf16> to vector<24x128xbf16>
    %c0_17 = arith.constant 0 : index
    %c15 = arith.constant 15 : index
    %c0_18 = arith.constant 0 : index
    %17 = vector.load %arg1[%c0_17, %c15, %c0_18] : memref<1x40x128xbf16, #tpu.memory_space<vmem>>, vector<1x24x128xbf16>
    %18 = vector.shape_cast %17 : vector<1x24x128xbf16> to vector<24x128xbf16>
    %19 = tpu.concatenate %2, %4, %6, %8, %10, %12, %14, %16, %18 in 1 : vector<24x128xbf16>, vector<24x128xbf16>, vector<24x128xbf16>, vector<24x128xbf16>, vector<24x128xbf16>, vector<24x128xbf16>, vector<24x128xbf16>, vector<24x128xbf16>, vector<24x128xbf16> -> vector<24x1152xbf16>
    %cst = arith.constant dense<0.000000e+00> : vector<24x128xf32>
    %20 = tpu.matmul %19, %0, %cst {dimension_numbers = #tpu.dot_dimension_numbers<[1], [0], [0], [1], [0, 0, 1, 1], [], []>} : vector<24x1152xbf16>, vector<1152x128xbf16>, vector<24x128xf32> -> vector<24x128xf32>
    %c0_19 = arith.constant 0 : index
    %c0_20 = arith.constant 0 : index
    %21 = vector.load %arg3[%c0_19, %c0_20] : memref<1x128xf32, #tpu.memory_space<vmem>>, vector<1x128xf32>
    %22 = vector.broadcast %21 : vector<1x128xf32> to vector<24x128xf32>
    %23 = arith.addf %20, %22 : vector<24x128xf32>
    %cst_21 = arith.constant 0.000000e+00 : bf16
    %24 = vector.broadcast %cst_21 : bf16 to vector<8x128xbf16>
    %c0_22 = arith.constant 0 : index
    %c0_23 = arith.constant 0 : index
    %25 = vector.load %arg8[%c0_22, %c0_23] : memref<40x128xbf16, #tpu.memory_space<vmem>>, vector<8x128xbf16>
    tpu.vector_store %arg8[%c0_22, %c0_23], %24 {strides = array<i32>} : memref<40x128xbf16, #tpu.memory_space<vmem>>, vector<8x128xbf16>,
    %cst_24 = arith.constant 0.000000e+00 : bf16
    %26 = vector.broadcast %cst_24 : bf16 to vector<8x128xbf16>
    %c32 = arith.constant 32 : index
    %c0_25 = arith.constant 0 : index
    %27 = vector.load %arg8[%c32, %c0_25] : memref<40x128xbf16, #tpu.memory_space<vmem>>, vector<8x128xbf16>
    tpu.vector_store %arg8[%c32, %c0_25], %26 {strides = array<i32>} : memref<40x128xbf16, #tpu.memory_space<vmem>>, vector<8x128xbf16>,
    %c0_26 = arith.constant 0 : index
    %c0_27 = arith.constant 0 : index
    %28 = vector.load %arg6[%c0_26, %c0_27] : memref<24x128xbf16, #tpu.memory_space<vmem>>, vector<24x128xbf16>
    %cst_28 = arith.constant 0.000000e+00 : f32
    %29 = vector.broadcast %cst_28 : f32 to vector<24x128xf32>
    %30 = arith.maximumf %23, %29 : vector<24x128xf32>
    %31 = arith.extf %28 : vector<24x128xbf16> to vector<24x128xf32>
    %32 = arith.mulf %30, %31 : vector<24x128xf32>
    %33 = arith.truncf %32 : vector<24x128xf32> to vector<24x128xbf16>
    %c8_29 = arith.constant 8 : index
    %c0_30 = arith.constant 0 : index
    %34 = vector.load %arg8[%c8_29, %c0_30] : memref<40x128xbf16, #tpu.memory_space<vmem>>, vector<24x128xbf16>
    tpu.vector_store %arg8[%c8_29, %c0_30], %33 {strides = array<i32>} : memref<40x128xbf16, #tpu.memory_space<vmem>>, vector<24x128xbf16>,
    %c0_31 = arith.constant 0 : index
    %c0_32 = arith.constant 0 : index
    %c0_33 = arith.constant 0 : index
    %35 = vector.load %arg4[%c0_31, %c0_32, %c0_33] : memref<2x1152x128xbf16, #tpu.memory_space<vmem>>, vector<1x1152x128xbf16>
    %36 = vector.shape_cast %35 : vector<1x1152x128xbf16> to vector<1152x128xbf16>
    %c1_34 = arith.constant 1 : index
    %c0_35 = arith.constant 0 : index
    %37 = vector.load %arg8[%c1_34, %c0_35] : memref<40x128xbf16, #tpu.memory_space<vmem>>, vector<24x128xbf16>
    %c2_36 = arith.constant 2 : index
    %c0_37 = arith.constant 0 : index
    %38 = vector.load %arg8[%c2_36, %c0_37] : memref<40x128xbf16, #tpu.memory_space<vmem>>, vector<24x128xbf16>
    %c3_38 = arith.constant 3 : index
    %c0_39 = arith.constant 0 : index
    %39 = vector.load %arg8[%c3_38, %c0_39] : memref<40x128xbf16, #tpu.memory_space<vmem>>, vector<24x128xbf16>
    %c7_40 = arith.constant 7 : index
    %c0_41 = arith.constant 0 : index
    %40 = vector.load %arg8[%c7_40, %c0_41] : memref<40x128xbf16, #tpu.memory_space<vmem>>, vector<24x128xbf16>
    %c8_42 = arith.constant 8 : index
    %c0_43 = arith.constant 0 : index
    %41 = vector.load %arg8[%c8_42, %c0_43] : memref<40x128xbf16, #tpu.memory_space<vmem>>, vector<24x128xbf16>
    %c9_44 = arith.constant 9 : index
    %c0_45 = arith.constant 0 : index
    %42 = vector.load %arg8[%c9_44, %c0_45] : memref<40x128xbf16, #tpu.memory_space<vmem>>, vector<24x128xbf16>
    %c13_46 = arith.constant 13 : index
    %c0_47 = arith.constant 0 : index
    %43 = vector.load %arg8[%c13_46, %c0_47] : memref<40x128xbf16, #tpu.memory_space<vmem>>, vector<24x128xbf16>
    %c14_48 = arith.constant 14 : index
    %c0_49 = arith.constant 0 : index
    %44 = vector.load %arg8[%c14_48, %c0_49] : memref<40x128xbf16, #tpu.memory_space<vmem>>, vector<24x128xbf16>
    %c15_50 = arith.constant 15 : index
    %c0_51 = arith.constant 0 : index
    %45 = vector.load %arg8[%c15_50, %c0_51] : memref<40x128xbf16, #tpu.memory_space<vmem>>, vector<24x128xbf16>
    %46 = tpu.concatenate %37, %38, %39, %40, %41, %42, %43, %44, %45 in 1 : vector<24x128xbf16>, vector<24x128xbf16>, vector<24x128xbf16>, vector<24x128xbf16>, vector<24x128xbf16>, vector<24x128xbf16>, vector<24x128xbf16>, vector<24x128xbf16>, vector<24x128xbf16> -> vector<24x1152xbf16>
    %cst_52 = arith.constant dense<0.000000e+00> : vector<24x128xf32>
    %47 = tpu.matmul %46, %36, %cst_52 {dimension_numbers = #tpu.dot_dimension_numbers<[1], [0], [0], [1], [0, 0, 1, 1], [], []>} : vector<24x1152xbf16>, vector<1152x128xbf16>, vector<24x128xf32> -> vector<24x128xf32>
    %cst_53 = arith.constant 0.000000e+00 : f32
    %48 = vector.broadcast %cst_53 : f32 to vector<24x128xf32>
    %49 = arith.maximumf %47, %48 : vector<24x128xf32>
    %50 = arith.truncf %49 : vector<24x128xf32> to vector<24x128xbf16>
    %c0_54 = arith.constant 0 : index
    %c0_55 = arith.constant 0 : index
    %c0_56 = arith.constant 0 : index
    %51 = vector.load %arg5[%c0_54, %c0_55, %c0_56] : memref<2x128x128xbf16, #tpu.memory_space<vmem>>, vector<1x128x128xbf16>
    %52 = vector.shape_cast %51 : vector<1x128x128xbf16> to vector<128x128xbf16>
    %cst_57 = arith.constant dense<0.000000e+00> : vector<24x128xf32>
    %53 = tpu.matmul %50, %52, %cst_57 {dimension_numbers = #tpu.dot_dimension_numbers<[1], [0], [0], [1], [0, 0, 1, 1], [], []>} : vector<24x128xbf16>, vector<128x128xbf16>, vector<24x128xf32> -> vector<24x128xf32>
    %54 = arith.addf %23, %53 : vector<24x128xf32>
    %cst_58 = arith.constant 0.000000e+00 : f32
    %55 = vector.broadcast %cst_58 : f32 to vector<24x128xf32>
    %56 = arith.maximumf %54, %55 : vector<24x128xf32>
    %57 = arith.extf %28 : vector<24x128xbf16> to vector<24x128xf32>
    %58 = arith.mulf %56, %57 : vector<24x128xf32>
    %59 = arith.truncf %58 : vector<24x128xf32> to vector<24x128xbf16>
    %c8_59 = arith.constant 8 : index
    %c0_60 = arith.constant 0 : index
    %60 = vector.load %arg8[%c8_59, %c0_60] : memref<40x128xbf16, #tpu.memory_space<vmem>>, vector<24x128xbf16>
    tpu.vector_store %arg8[%c8_59, %c0_60], %59 {strides = array<i32>} : memref<40x128xbf16, #tpu.memory_space<vmem>>, vector<24x128xbf16>,
    %c1_61 = arith.constant 1 : index
    %c0_62 = arith.constant 0 : index
    %c0_63 = arith.constant 0 : index
    %61 = vector.load %arg4[%c1_61, %c0_62, %c0_63] : memref<2x1152x128xbf16, #tpu.memory_space<vmem>>, vector<1x1152x128xbf16>
    %62 = vector.shape_cast %61 : vector<1x1152x128xbf16> to vector<1152x128xbf16>
    %c1_64 = arith.constant 1 : index
    %c0_65 = arith.constant 0 : index
    %63 = vector.load %arg8[%c1_64, %c0_65] : memref<40x128xbf16, #tpu.memory_space<vmem>>, vector<24x128xbf16>
    %c2_66 = arith.constant 2 : index
    %c0_67 = arith.constant 0 : index
    %64 = vector.load %arg8[%c2_66, %c0_67] : memref<40x128xbf16, #tpu.memory_space<vmem>>, vector<24x128xbf16>
    %c3_68 = arith.constant 3 : index
    %c0_69 = arith.constant 0 : index
    %65 = vector.load %arg8[%c3_68, %c0_69] : memref<40x128xbf16, #tpu.memory_space<vmem>>, vector<24x128xbf16>
    %c7_70 = arith.constant 7 : index
    %c0_71 = arith.constant 0 : index
    %66 = vector.load %arg8[%c7_70, %c0_71] : memref<40x128xbf16, #tpu.memory_space<vmem>>, vector<24x128xbf16>
    %c8_72 = arith.constant 8 : index
    %c0_73 = arith.constant 0 : index
    %67 = vector.load %arg8[%c8_72, %c0_73] : memref<40x128xbf16, #tpu.memory_space<vmem>>, vector<24x128xbf16>
    %c9_74 = arith.constant 9 : index
    %c0_75 = arith.constant 0 : index
    %68 = vector.load %arg8[%c9_74, %c0_75] : memref<40x128xbf16, #tpu.memory_space<vmem>>, vector<24x128xbf16>
    %c13_76 = arith.constant 13 : index
    %c0_77 = arith.constant 0 : index
    %69 = vector.load %arg8[%c13_76, %c0_77] : memref<40x128xbf16, #tpu.memory_space<vmem>>, vector<24x128xbf16>
    %c14_78 = arith.constant 14 : index
    %c0_79 = arith.constant 0 : index
    %70 = vector.load %arg8[%c14_78, %c0_79] : memref<40x128xbf16, #tpu.memory_space<vmem>>, vector<24x128xbf16>
    %c15_80 = arith.constant 15 : index
    %c0_81 = arith.constant 0 : index
    %71 = vector.load %arg8[%c15_80, %c0_81] : memref<40x128xbf16, #tpu.memory_space<vmem>>, vector<24x128xbf16>
    %72 = tpu.concatenate %63, %64, %65, %66, %67, %68, %69, %70, %71 in 1 : vector<24x128xbf16>, vector<24x128xbf16>, vector<24x128xbf16>, vector<24x128xbf16>, vector<24x128xbf16>, vector<24x128xbf16>, vector<24x128xbf16>, vector<24x128xbf16>, vector<24x128xbf16> -> vector<24x1152xbf16>
    %cst_82 = arith.constant dense<0.000000e+00> : vector<24x128xf32>
    %73 = tpu.matmul %72, %62, %cst_82 {dimension_numbers = #tpu.dot_dimension_numbers<[1], [0], [0], [1], [0, 0, 1, 1], [], []>} : vector<24x1152xbf16>, vector<1152x128xbf16>, vector<24x128xf32> -> vector<24x128xf32>
    %cst_83 = arith.constant 0.000000e+00 : f32
    %74 = vector.broadcast %cst_83 : f32 to vector<24x128xf32>
    %75 = arith.maximumf %73, %74 : vector<24x128xf32>
    %76 = arith.truncf %75 : vector<24x128xf32> to vector<24x128xbf16>
    %c1_84 = arith.constant 1 : index
    %c0_85 = arith.constant 0 : index
    %c0_86 = arith.constant 0 : index
    %77 = vector.load %arg5[%c1_84, %c0_85, %c0_86] : memref<2x128x128xbf16, #tpu.memory_space<vmem>>, vector<1x128x128xbf16>
    %78 = vector.shape_cast %77 : vector<1x128x128xbf16> to vector<128x128xbf16>
    %cst_87 = arith.constant dense<0.000000e+00> : vector<24x128xf32>
    %79 = tpu.matmul %76, %78, %cst_87 {dimension_numbers = #tpu.dot_dimension_numbers<[1], [0], [0], [1], [0, 0, 1, 1], [], []>} : vector<24x128xbf16>, vector<128x128xbf16>, vector<24x128xf32> -> vector<24x128xf32>
    %80 = arith.addf %54, %79 : vector<24x128xf32>
    %cst_88 = arith.constant 0.000000e+00 : f32
    %81 = vector.broadcast %cst_88 : f32 to vector<24x128xf32>
    %82 = arith.maximumf %80, %81 : vector<24x128xf32>
    %83 = arith.truncf %82 : vector<24x128xf32> to vector<24x128xbf16>
    %c0_89 = arith.constant 0 : index
    %c0_90 = arith.constant 0 : index
    %c0_91 = arith.constant 0 : index
    %84 = vector.load %arg7[%c0_89, %c0_90, %c0_91] : memref<1x24x128xbf16, #tpu.memory_space<vmem>>, vector<1x24x128xbf16>
    %85 = vector.shape_cast %84 : vector<1x24x128xbf16> to vector<24x128xbf16>
    %86 = vector.shape_cast %83 : vector<24x128xbf16> to vector<1x24x128xbf16>
    tpu.vector_store %arg7[%c0_89, %c0_90, %c0_91], %86 {strides = array<i32>} : memref<1x24x128xbf16, #tpu.memory_space<vmem>>, vector<1x24x128xbf16>,
    return
  }
  func.func @transform_0(%arg0: i32) -> (i32, i32, i32) {
    %c0_i32 = arith.constant 0 : i32
    %c0_i32_0 = arith.constant 0 : i32
    %c0_i32_1 = arith.constant 0 : i32
    return %arg0, %c0_i32, %c0_i32_0 : i32, i32, i32
  }
  func.func @transform_1(%arg0: i32) -> (i32, i32) {
    %c0_i32 = arith.constant 0 : i32
    %c0_i32_0 = arith.constant 0 : i32
    %c0_i32_1 = arith.constant 0 : i32
    return %c0_i32, %c0_i32_0 : i32, i32
  }
  func.func @transform_2(%arg0: i32) -> (i32, i32) {
    %c0_i32 = arith.constant 0 : i32
    %c0_i32_0 = arith.constant 0 : i32
    %c0_i32_1 = arith.constant 0 : i32
    return %c0_i32, %c0_i32_0 : i32, i32
  }
  func.func @transform_3(%arg0: i32) -> (i32, i32, i32) {
    %c0_i32 = arith.constant 0 : i32
    %c0_i32_0 = arith.constant 0 : i32
    %c0_i32_1 = arith.constant 0 : i32
    %c0_i32_2 = arith.constant 0 : i32
    return %c0_i32, %c0_i32_0, %c0_i32_1 : i32, i32, i32
  }
  func.func @transform_4(%arg0: i32) -> (i32, i32, i32) {
    %c0_i32 = arith.constant 0 : i32
    %c0_i32_0 = arith.constant 0 : i32
    %c0_i32_1 = arith.constant 0 : i32
    %c0_i32_2 = arith.constant 0 : i32
    return %c0_i32, %c0_i32_0, %c0_i32_1 : i32, i32, i32
  }
  func.func @transform_5(%arg0: i32) -> (i32, i32) {
    %c0_i32 = arith.constant 0 : i32
    %c0_i32_0 = arith.constant 0 : i32
    %c0_i32_1 = arith.constant 0 : i32
    return %c0_i32, %c0_i32_0 : i32, i32
  }
  func.func @transform_6(%arg0: i32) -> (i32, i32, i32) {
    %c0_i32 = arith.constant 0 : i32
    %c0_i32_0 = arith.constant 0 : i32
    %c0_i32_1 = arith.constant 0 : i32
    return %arg0, %c0_i32, %c0_i32_0 : i32, i32, i32
  }
}

</mosaic_0001>

<bundles_post_ra>
// kernel: encoder_forward.3
= control target key start
LH: loop header
LB: loop body
LE: loop exit
PB: predicated region body
PF: predicated region fallthrough
CT: control target
= control target key end

     0   :  { %s548_s12 = smov 0   ;;  %s584_s0 = inlined_call_operand.vmem [shape: bf16[128,48], index: 0, kind: input, shape index: {}]   ;;  %s585_s1 = inlined_call_operand.vmem [shape: bf16[48,128], index: 1, kind: input, shape index: {}]   ;;  %s586_s2 = inlined_call_operand.vmem [shape: f32[1,128], index: 2, kind: input, shape index: {}]   ;;  %s587_s3 = inlined_call_operand.vmem [shape: bf16[128,128], index: 3, kind: output, shape index: {}]  }
   0x1 LB: > { %s416_s13 = sadd.s32 4294967295, %s526_s12   ;;  %p420_p0 = scmp.ge.s32.totalorder %s526_s12, 1  ;;  %s526_s12 = sphi %s548_s12, %s13_s12  }
   0x2   : > { %p138_p1 = scmp.lt.s32.totalorder %s526_s12, 3 }
   0x4   : > { %p139_p2 = pnand %p420_p0, %p138_p1 }
   0x5   : > { %s421_s16 = sshll.u32 (!%p139_p2), %s416_s13, 3 }
   0x6   : > { %142 = sbr.rel (%p139_p2) target bundleno = 230 (0xe6), region = 32  ;;  %p163_p3 = scmp.lt.s32.totalorder (!%p139_p2), %s421_s16, 15 }
   0xb   : > { %v513_v0 = vld [vmem:[%s585_s1 + $0x10] sm:$0xff]   ;;  %v514_v1 = vld [vmem:[%s585_s1 + $0x8] sm:$0xff]   ;;  %s589_s16 = smov (!%p163_p3, %s421_s16), 15  ;;  %v515_v2 = vld [vmem:[%s585_s1] sm:$0xff]   ;;  %vm234_vm0 = vcmask 392192  }
   0xc   : > { %485 = vmatprep.subr.bf16.mxu0 %v513_v0  ;;  %499 = vmatprep.subr.bf16.mxu1 %v513_v0  ;;  %s422_s21 = sshll.u32 %s589_s16, 2  ;;  %v425_v7 = vld [vmem:[%s586_s2] ss:$0 sm:$0xff] }
   0xd   : > { %486 = vmatpush3.bf16.msra.mxu0 %v513_v0  ;;  %502 = vmatpush3.bf16.msra.mxu1 %v513_v0  ;;  %s166_s24 = scalar_lea.vmem %s584_s0, %s422_s21  ;;  %s172_s29 = scalar_lea.vmem %s587_s3, %s422_s21 }
   0xe   : > { %487 = vmatprep.subr.bf16.mxu0 %v514_v1  ;;  %500 = vmatprep.subr.bf16.mxu1 %v514_v1  ;;  %v516_v3 = vld [vmem:[%s166_s24] sm:$0xff]   ;;  %v517_v4 = vld [vmem:[%s166_s24 + $0x10] sm:$0xff]   ;;  %v518_v5 = vld [vmem:[%s166_s24 + $0x8] sm:$0xff]  }
   0xf   : > { %491 = vmatprep.mubr.msk.bf16.mxu0 %vm234_vm0, %v516_v3  ;;  %495 = vmatprep.mubr.msk.bf16.mxu1 %vm234_vm0, %v517_v4  ;;  %v519_v6 = vld [vmem:[%s166_s24 + $0x18] sm:$0xff]  }
  0x11   : > { %488 = vmatpush3.bf16.msra.mxu0 %v514_v1  ;;  %503 = vmatpush3.bf16.msra.mxu1 %v514_v1 }
  0x12   : > { %489 = vmatprep.subr.bf16.mxu0 %v515_v2  ;;  %501 = vmatprep.subr.bf16.mxu1 %v515_v2 }
  0x15   : > { %490 = vmatpush3.bf16.msra.mxu0 %v515_v2  ;;  %504 = vmatpush3.bf16.msra.mxu1 %v515_v2 }
  0x18   : > { %492 = vmatmul.mubr.msk.bf16.vlgmr.msra.gmra.mxu0 %vm234_vm0, %v518_v5  ;;  %496 = vmatmul.mubr.msk.bf16.vlgmr.msra.gmra.mxu1 %vm234_vm0, %v519_v6 }
  0xd8   : > { %v493_v8 = vpop.f32.mrf.mxu0  ;;  %v497_v9 = vpop.f32.mrf.mxu1 }
  0xd9   : > { %v290_v10 = vadd.f32 %v493_v8, %v425_v7  ;;  %v306_v11 = vadd.f32 %v497_v9, %v425_v7 }
  0xda   : > { %v281_v12 = vpop.f32.mrf.mxu0  ;;  %v297_v13 = vpop.f32.mrf.mxu1 }
  0xdb   : > { %v282_v14 = vadd.f32 %v425_v7, %v281_v12  ;;  %v298_v15 = vadd.f32 %v425_v7, %v297_v13  ;;  %v314_v20 = vmax.f32 %v290_v10, 0.0  ;;  %v318_v21 = vmax.f32 %v306_v11, 0.0 }
  0xdc   : > { %v494_v16 = vpop.f32.mrf.mxu0  ;;  %v498_v17 = vpop.f32.mrf.mxu1 }
  0xdd   : > { %v293_v18 = vadd.f32 %v494_v16, %v425_v7  ;;  %v309_v19 = vadd.f32 %v498_v17, %v425_v7  ;;  %v312_v28 = vmax.f32 %v282_v14, 0.0  ;;  %v316_v29 = vmax.f32 %v298_v15, 0.0 }
  0xde   : > { %v284_v22 = vpop.f32.mrf.mxu0  ;;  %v300_v23 = vpop.f32.mrf.mxu1 }
  0xdf   : > { %v315_v24 = vmax.f32 %v293_v18, 0.0  ;;  %v319_v25 = vmax.f32 %v309_v19, 0.0  ;;  %v285_v26 = vadd.f32 %v425_v7, %v284_v22  ;;  %v301_v27 = vadd.f32 %v425_v7, %v300_v23 }
  0xe1   : > { %v463_v30 = vpack.c.bf16 %v315_v24, %v314_v20  ;;  %v473_v31 = vpack.c.bf16 %v319_v25, %v318_v21  ;;  %v313_v32 = vmax.f32 %v285_v26, 0.0  ;;  %v317_v33 = vmax.f32 %v301_v27, 0.0 }
  0xe3   : > { %475 = vst [vmem:[%s172_s29 + $0x8] sm:$0xff] %v463_v30   ;;  %477 = vst [vmem:[%s172_s29 + $0x18] sm:$0xff] %v473_v31   ;;  %v458_v34 = vpack.c.bf16 %v313_v32, %v312_v28  ;;  %v468_v35 = vpack.c.bf16 %v317_v33, %v316_v29 }
  0xe5   : > { %459 = vst [vmem:[%s172_s29] sm:$0xff] %v458_v34   ;;  %476 = vst [vmem:[%s172_s29 + $0x10] sm:$0xff] %v468_v35  }
  0xe6 PF: > { %s13_s12 = sadd.s32 1, %s526_s12  }
  0xe7   : > { %p10_p4 = scmp.ge.s32.totalorder %s13_s12, 4  }
  0xe9   :  { %12 = sbr.rel (!%p10_p4) target bundleno = 1 (0x1), region = 62 }

// kernel: encoder_forward.4
= control target key start
LH: loop header
LB: loop body
LE: loop exit
PB: predicated region body
PF: predicated region fallthrough
CT: control target
= control target key end

     0   :  { %s552_s12 = smov 0   ;;  %s624_s0 = inlined_call_operand.vmem [shape: bf16[32,256], index: 0, kind: input, shape index: {}]   ;;  %s625_s1 = inlined_call_operand.vmem [shape: bf16[256,128], index: 1, kind: input, shape index: {}]   ;;  %s626_s2 = inlined_call_operand.vmem [shape: f32[1,128], index: 2, kind: input, shape index: {}]   ;;  %s627_s3 = inlined_call_operand.vmem [shape: bf16[32,128], index: 3, kind: output, shape index: {}]  }
   0x1 LB: > { %s434_s13 = sadd.s32 4294967295, %s530_s12   ;;  %p438_p0 = scmp.ge.s32.totalorder %s530_s12, 1  ;;  %s530_s12 = sphi %s552_s12, %s13_s12  }
   0x2   : > { %p139_p1 = scmp.lt.s32.totalorder %s530_s12, 3 }
   0x4   : > { %p140_p2 = pnand %p438_p0, %p139_p1 }
   0x5   : > { %s439_s16 = sshll.u32 (!%p140_p2), %s434_s13, 1 }
   0x6   : > { %143 = sbr.rel (%p140_p2) target bundleno = 252 (0xfc), region = 32  ;;  %p165_p3 = scmp.lt.s32.totalorder (!%p140_p2), %s439_s16, 3 }
   0xb   : > { %v505_v0 = vld [vmem:[%s625_s1 + $0x78] sm:$0xff]   ;;  %v507_v2 = vld [vmem:[%s625_s1 + $0x70] sm:$0xff]   ;;  %v509_v4 = vld [vmem:[%s625_s1 + $0x68] sm:$0xff]   ;;  %s629_s16 = smov (!%p165_p3, %s439_s16), 3 }
   0xc   : > { %v506_v1 = vld [vmem:[%s625_s1 + $0x38] sm:$0xff]   ;;  %475 = vmatprep.subr.bf16.mxu0 %v505_v0  ;;  %v508_v3 = vld [vmem:[%s625_s1 + $0x30] sm:$0xff]   ;;  %v510_v5 = vld [vmem:[%s625_s1 + $0x28] sm:$0xff]   ;;  %s467_s4 = sshll.u32 %s629_s16, 3  ;;  %s443_s28 = sshll.u32 %s629_s16, 2 }
   0xd   : > { %476 = vmatpush3.bf16.msra.mxu0 %v506_v1  ;;  %v511_v6 = vld [vmem:[%s625_s1 + $0x60] sm:$0xff]   ;;  %v513_v8 = vld [vmem:[%s625_s1 + $0x58] sm:$0xff]   ;;  %s169_s9 = scalar_lea.vmem %s624_s0, %s467_s4  ;;  %v515_v10 = vld [vmem:[%s625_s1 + $0x50] sm:$0xff]   ;;  %s175_s4 = scalar_lea.vmem %s627_s3, %s443_s28 }
   0xe   : > { %477 = vmatprep.subr.bf16.mxu0 %v507_v2  ;;  %v512_v7 = vld [vmem:[%s625_s1 + $0x20] sm:$0xff]   ;;  %v514_v9 = vld [vmem:[%s625_s1 + $0x18] sm:$0xff]   ;;  %v516_v12 = vld [vmem:[%s625_s1 + $0x10] sm:$0xff]  }
   0xf   : > { %v523_v11 = vld [vmem:[%s169_s9 + $0x4] ss:$8 sps:$4 sm:$0xff]   ;;  %v521_v17 = vld [vmem:[%s169_s9] ss:$8 sps:$4 sm:$0xff]  }
  0x10   : > { %357 = vmatprep.mubr.bf16.mxu0 %v523_v11  ;;  %v517_v13 = vld [vmem:[%s625_s1 + $0x48] sm:$0xff]   ;;  %v519_v15 = vld [vmem:[%s625_s1 + $0x40] sm:$0xff]  }
  0x11   : > { %478 = vmatpush3.bf16.msra.mxu0 %v508_v3  ;;  %v518_v14 = vld [vmem:[%s625_s1 + $0x8] sm:$0xff]   ;;  %v520_v16 = vld [vmem:[%s625_s1] sm:$0xff]  }
  0x12   : > { %479 = vmatprep.subr.bf16.mxu0 %v509_v4  ;;  %v444_v21 = vld [vmem:[%s626_s2] ss:$0 sm:$0xff] }
  0x15   : > { %480 = vmatpush3.bf16.msra.mxu0 %v510_v5 }
  0x16   : > { %481 = vmatprep.subr.bf16.mxu0 %v511_v6 }
  0x19   : > { %482 = vmatpush3.bf16.msra.mxu0 %v512_v7 }
  0x1a   : > { %483 = vmatprep.subr.bf16.mxu0 %v513_v8 }
  0x1d   : > { %484 = vmatpush3.bf16.msra.mxu0 %v514_v9 }
  0x1e   : > { %485 = vmatprep.subr.bf16.mxu0 %v515_v10 }
  0x21   : > { %486 = vmatpush3.bf16.msra.mxu0 %v516_v12 }
  0x22   : > { %487 = vmatprep.subr.bf16.mxu0 %v517_v13 }
  0x25   : > { %488 = vmatpush3.bf16.msra.mxu0 %v518_v14 }
  0x26   : > { %489 = vmatprep.subr.bf16.mxu0 %v519_v15 }
  0x29   : > { %490 = vmatpush3.bf16.msra.mxu0 %v520_v16 }
  0x2c   : > { %358 = vmatmul.mubr.bf16.vlgmr.msra.gmra.mxu0 %v521_v17 }
  0xec   : > { %v491_v18 = vpop.f32.mrf.mxu0 }
  0xee   : > { %v492_v19 = vpop.f32.mrf.mxu0 }
  0xef   : > { %v493_v20 = vadd.f32 %v492_v19, %v491_v18 }
  0xf0   : > { %v494_v22 = vpop.f32.mrf.mxu0 }
  0xf1   : > { %v360_v24 = vadd.f32 %v493_v20, %v444_v21 }
  0xf2   : > { %v495_v23 = vpop.f32.mrf.mxu0 }
  0xf3   : > { %v496_v25 = vadd.f32 %v495_v23, %v494_v22  ;;  %v366_v27 = vmax.f32 %v360_v24, 0.0 }
  0xf5   : > { %v363_v26 = vadd.f32 %v496_v25, %v444_v21 }
  0xf7   : > { %v367_v28 = vmax.f32 %v363_v26, 0.0 }
  0xf9   : > { %v473_v29 = vpack.c.bf16 %v367_v28, %v366_v27 }
  0xfb   : > { %474 = vst [vmem:[%s175_s4] sm:$0xff] %v473_v29  }
  0xfc PF: > { %s13_s12 = sadd.s32 1, %s530_s12  }
  0xfd   : > { %p10_p4 = scmp.ge.s32.totalorder %s13_s12, 4  }
  0xff   :  { %12 = sbr.rel (!%p10_p4) target bundleno = 1 (0x1), region = 62 }

// kernel: encoder_forward.5
= control target key start
LH: loop header
LB: loop body
LE: loop exit
PB: predicated region body
PF: predicated region fallthrough
CT: control target
= control target key end

     0   :  { %s5181_s21 = smov 0   ;;  %s6213_s0 = inlined_call_operand.vmem [shape: bf16[2,40,128], index: 0, kind: input, shape index: {}]   ;;  %s6214_s1 = inlined_call_operand.vmem [shape: bf16[1152,128], index: 1, kind: input, shape index: {}]   ;;  %s6215_s2 = inlined_call_operand.vmem [shape: f32[1,128], index: 2, kind: input, shape index: {}]   ;;  %s6216_s3 = inlined_call_operand.vmem [shape: bf16[2,1152,128], index: 3, kind: input, shape index: {}]   ;;  %s6217_s4 = inlined_call_operand.vmem [shape: bf16[2,128,128], index: 4, kind: input, shape index: {}]   ;;  %s6218_s5 = inlined_call_operand.vmem [shape: bf16[24,128], index: 5, kind: input, shape index: {}]   ;;  %s6219_s6 = inlined_call_operand.vmem [shape: bf16[2,24,128], index: 6, kind: output, shape index: {}]  }
   0x1 LB: > { %s3883_s22 = sadd.s32 4294967295, %s5143_s21   ;;  %p3887_p0 = scmp.ge.s32.totalorder %s5143_s21, 1  ;;  %s5143_s21 = sphi %s5181_s21, %s16_s21  }
   0x2   : > { %p212_p1 = scmp.lt.s32.totalorder %s5143_s21, 3 }
   0x4   : > { %p213_p2 = pnand %p3887_p0, %p212_p1 }
   0x5   : > { %p242_p3 = scmp.lt.s32.totalorder (!%p213_p2), %s3883_s22, 1 }
   0x6   : > { %216 = sbr.rel (%p213_p2) target bundleno = 1318 (0x526), region = 44 }
   0xb   : > { %v4863_v0 = vld [vmem:[%s6214_s1 + $0x78] sm:$0xff]   ;;  %v4867_v4 = vld [vmem:[%s6214_s1 + $0x70] sm:$0xff]   ;;  %v4871_v8 = vld [vmem:[%s6214_s1 + $0x68] sm:$0xff]   ;;  %s6221_s22 = smov (!%p242_p3, %s3883_s22), 1  ;;  %vm426_vm0 = vsmask.f32 7424 }
   0xc   : > { %v4864_v1 = vld [vmem:[%s6214_s1 + $0x38] sm:$0xff]   ;;  %4366 = vmatprep.subr.bf16.mxu0 %v4863_v0  ;;  %v4868_v5 = vld [vmem:[%s6214_s1 + $0x30] sm:$0xff]   ;;  %v4872_v9 = vld [vmem:[%s6214_s1 + $0x28] sm:$0xff]   ;;  %s4852_s29 = smul.u32 20, %s6221_s22  ;;  %vm455_vm1 = vcmask 1044480   ;;  %vm445_vm2 = vcmask 1046528  }
   0xd   : > { %v4865_v2 = vld [vmem:[%s6214_s1 + $0xf8] sm:$0xff]   ;;  %4367 = vmatpush3.bf16.msra.mxu0 %v4864_v1  ;;  %v4869_v6 = vld [vmem:[%s6214_s1 + $0xf0] sm:$0xff]   ;;  %v4873_v10 = vld [vmem:[%s6214_s1 + $0xe8] sm:$0xff]   ;;  %vm493_vm3 = vcmask 1045504   ;;  %vm461_vm4 = vsmask.f32 256 }
   0xe   : > { %v4866_v3 = vld [vmem:[%s6214_s1 + $0xb8] sm:$0xff]   ;;  %4394 = vmatprep.subr.bf16.mxu1 %v4865_v2  ;;  %4368 = vmatprep.subr.bf16.mxu0 %v4867_v4  ;;  %v4870_v7 = vld [vmem:[%s6214_s1 + $0xb0] sm:$0xff]   ;;  %v4874_v11 = vld [vmem:[%s6214_s1 + $0xa8] sm:$0xff]   ;;  %s5286_s16 = scalar_lea.vmem %s6213_s0, %s4852_s29  ;;  %vm500_vm5 = vsmask.f32 5376  ;;  %s4853_s13 = smul.u32 12, %s6221_s22 }
   0xf   : > { %4395 = vmatpush3.bf16.msra.mxu1 %v4866_v3  ;;  %v4875_v12 = vld [vmem:[%s6214_s1 + $0x60] sm:$0xff]   ;;  %v4879_v16 = vld [vmem:[%s6214_s1 + $0x58] sm:$0xff]   ;;  %v4883_v20 = vld [vmem:[%s6214_s1 + $0x50] sm:$0xff]  }
  0x10   : > { %4396 = vmatprep.subr.bf16.mxu1 %v4869_v6  ;;  %v4876_v13 = vld [vmem:[%s6214_s1 + $0x20] sm:$0xff]   ;;  %v4880_v17 = vld [vmem:[%s6214_s1 + $0x18] sm:$0xff]   ;;  %v4884_v21 = vld [vmem:[%s6214_s1 + $0x10] sm:$0xff]   ;;  %s251_s17 = scalar_lea.vmem %s6219_s6, %s4853_s13 }
  0x11   : > { %4369 = vmatpush3.bf16.msra.mxu0 %v4868_v5  ;;  %v4877_v14 = vld [vmem:[%s6214_s1 + $0xe0] sm:$0xff]   ;;  %v4881_v18 = vld [vmem:[%s6214_s1 + $0xd8] sm:$0xff]   ;;  %v4885_v22 = vld [vmem:[%s6214_s1 + $0xd0] sm:$0xff]  }
  0x12   : > { %4370 = vmatprep.subr.bf16.mxu0 %v4871_v8  ;;  %v4878_v15 = vld [vmem:[%s6214_s1 + $0xa0] sm:$0xff]   ;;  %v4882_v19 = vld [vmem:[%s6214_s1 + $0x98] sm:$0xff]   ;;  %v4886_v23 = vld [vmem:[%s6214_s1 + $0x90] sm:$0xff]  }
  0x13   : > { %4397 = vmatpush3.bf16.msra.mxu1 %v4870_v7  ;;  %v4887_v24 = vld [vmem:[%s6214_s1 + $0x48] sm:$0xff]   ;;  %v4891_v28 = vld [vmem:[%s6214_s1 + $0x40] sm:$0xff]   ;;  %v4898_v44 = vld [vmem:[%s6214_s1 + $0x178] sm:$0xff]  }
  0x14   : > { %4398 = vmatprep.subr.bf16.mxu1 %v4873_v10  ;;  %v4888_v25 = vld [vmem:[%s6214_s1 + $0x8] sm:$0xff]   ;;  %v4892_v29 = vld [vmem:[%s6214_s1] sm:$0xff]   ;;  %v4904_v50 = vld [vmem:[%s6214_s1 + $0x1f8] sm:$0xff]  }
  0x15   : > { %4371 = vmatpush3.bf16.msra.mxu0 %v4872_v9  ;;  %v4889_v26 = vld [vmem:[%s6214_s1 + $0xc8] sm:$0xff]   ;;  %v4893_v30 = vld [vmem:[%s6214_s1 + $0xc0] sm:$0xff]  }
  0x16   : > { %4372 = vmatprep.subr.bf16.mxu0 %v4875_v12  ;;  %v4890_v27 = vld [vmem:[%s6214_s1 + $0x88] sm:$0xff]   ;;  %v5295_v31 = vld [vmem:[%s5286_s16 + $0x4] sm:$0xf]  ;;  %v401_v34 = vld [vmem:[%s5286_s16] sm:$0xe] }
  0x17   : > { %4399 = vmatpush3.bf16.msra.mxu1 %v4874_v11  ;;  %v5298_v32 = vld [vmem:[%s5286_s16 + $0x8] sm:$0xf]  ;;  %v400_v33 = vld [vmem:[%s5286_s16 + $0xc] sm:$0x1]  ;;  %v3892_v36 = vcombine.low %v401_v34, %v5295_v31  ;;  %v4896_v37 = vld [vmem:[%s6214_s1 + $0x80] sm:$0xff]  }
  0x18   : > { %4400 = vmatprep.subr.bf16.mxu1 %v4877_v14  ;;  %v3891_v35 = vcombine.low %v5298_v32, %v400_v33  ;;  %v397_v38 = vld [vmem:[%s5286_s16] sm:$0xf]  ;;  %v5314_v48 = vld [vmem:[%s5286_s16 + $0xc] sm:$0xf] }
  0x19   : > { %4373 = vmatpush3.bf16.msra.mxu0 %v4876_v13  ;;  %v3890_v41 = vcombine.low %v397_v38, %v5295_v31  ;;  %v428_v42 = vshrl.u32 %v3892_v36, 16  ;;  %v430_v43 = vshll.u32 %v3892_v36, 16  ;;  %v403_v45 = vld [vmem:[%s5286_s16] sm:$0x8]  ;;  %v3895_v52 = vcombine.low %v5298_v32, %v5314_v48  ;;  %v402_v55 = vld [vmem:[%s5286_s16 + $0xc] sm:$0x3] }
  0x1a   : > { %4374 = vmatprep.subr.bf16.mxu0 %v4879_v16  ;;  %v435_v39 = vshll.u32 %v3891_v35, 16  ;;  %v439_v40 = vshrl.u32 %v3891_v35, 16  ;;  %v3894_v49 = vcombine.low %v403_v45, %v5295_v31  ;;  %v3893_v61 = vcombine.low %v5298_v32, %v402_v55  ;;  %v4902_v13 = vld [vmem:[%s6214_s1 + $0x138] sm:$0xff]   ;;  %v4909_v35 = vld [vmem:[%s6214_s1 + $0x1b0] sm:$0xff]   ;;  %v4911_v38 = vld [vmem:[%s6214_s1 + $0x128] sm:$0xff]  }
  0x1b   : > { %4401 = vmatpush3.bf16.msra.mxu1 %v4878_v15  ;;  %v534_v47 = vshll.u32 %v3890_v41, 16  ;;  %v432_v51 = vrot.slane %v430_v43, 1  ;;  %v532_v57 = vshrl.u32 %v3890_v41, 16  ;;  %v457_v59 = vrot.slane %v3895_v52, 3  ;;  %v4914_v41 = vld [vmem:[%s6214_s1 + $0x160] sm:$0xff]  }
  0x1c   : > { %4402 = vmatprep.subr.bf16.mxu1 %v4881_v18  ;;  %v437_v46 = vrot.slane %v435_v39, 1  ;;  %v456_v54 = vrot.slane %v3894_v49, 3  ;;  %v446_v3 = vrot.slane %v3892_v36, 1  ;;  %v447_v9 = vrot.slane %v3893_v61, 1  ;;  %v4916_v49 = vld [vmem:[%s6214_s1 + $0x1e0] sm:$0xff]   ;;  %v4924_v61 = vld [vmem:[%s6214_s1 + $0x1d0] sm:$0xff]  }
  0x1d   : > { %4375 = vmatpush3.bf16.msra.mxu0 %v4880_v17  ;;  %v433_v56 = vor.u32 %v432_v51, %v428_v42  ;;  %v536_v58 = vrot.slane %v534_v47, 1  ;;  %v571_v0 = vshll.u32 %v457_v59, 16  ;;  %v641_v33 = vshrl.u32 %v457_v59, 16  ;;  %v4913_v42 = vld [vmem:[%s6214_s1 + $0x1a8] sm:$0xff]  }
  0x1e   : > { %4376 = vmatprep.subr.bf16.mxu0 %v4883_v20  ;;  %v5322_v53 = vor.u32 %v439_v40, %v437_v46  ;;  %v458_v63 = vsel %vm455_vm1, %v456_v54, %v457_v59  ;;  %v448_v14 = vsel %vm445_vm2, %v446_v3, %v447_v9  ;;  %v559_v15 = vshll.u32 %v447_v9, 16  ;;  %v4912_v40 = vld [vmem:[%s6214_s1 + $0x1e8] sm:$0xff]   ;;  %v4920_v54 = vld [vmem:[%s6214_s1 + $0x1d8] sm:$0xff]  }
  0x1f   : > { %4403 = vmatpush3.bf16.msra.mxu1 %v4882_v19  ;;  %v438_v62 = vsel %vm426_vm0, %v433_v56, %v437_v46  ;;  %v537_v5 = vor.u32 %v536_v58, %v532_v57  ;;  %v564_v6 = vshrl.u32 %v458_v63, 16  ;;  %v566_v7 = vshll.u32 %v458_v63, 16  ;;  %v4922_v56 = vld [vmem:[%s6214_s1 + $0x150] sm:$0xff]   ;;  %v4921_v57 = vld [vmem:[%s6214_s1 + $0x198] sm:$0xff]   ;;  %v406_v3 = vld [vmem:[%s5286_s16 + $0x8] sm:$0xf] }
  0x20   : > { %4404 = vmatprep.subr.bf16.mxu1 %v4885_v22  ;;  %v547_v60 = vshll.u32 %v5322_v53, 16  ;;  %v540_v1 = vshrl.u32 %v438_v62, 16  ;;  %v542_v2 = vshll.u32 %v438_v62, 16  ;;  %v573_v11 = vrot.slane %v571_v0, 1  ;;  %v4926_v62 = vld [vmem:[%s6214_s1 + $0x148] sm:$0xff]   ;;  %v4925_v0 = vld [vmem:[%s6214_s1 + $0x190] sm:$0xff]  }
  0x21   : > { %4377 = vmatpush3.bf16.msra.mxu0 %v4884_v21  ;;  %v568_v10 = vrot.slane %v566_v7, 1  ;;  %v538_v16 = vsel %vm426_vm0, %v537_v5, %v437_v46  ;;  %v552_v18 = vshrl.u32 %v448_v14, 16  ;;  %v554_v19 = vshll.u32 %v448_v14, 16  ;;  %v4906_v21 = vld [vmem:[%s6214_s1 + $0x170] sm:$0xff]   ;;  %v4915_v46 = vld [vmem:[%s6214_s1 + $0x120] sm:$0xff]   ;;  %v4928_v14 = vld [vmem:[%s6214_s1 + $0x1c8] sm:$0xff]  }
  0x22   : > { %4378 = vmatprep.subr.bf16.mxu0 %v4887_v24  ;;  %v549_v4 = vrot.slane %v547_v60, 1  ;;  %v544_v8 = vrot.slane %v542_v2, 1  ;;  %v561_v24 = vrot.slane %v559_v15, 1  ;;  %v643_v36 = vor.u32 %v641_v33, %v573_v11  ;;  %v4923_v60 = vld [vmem:[%s6214_s1 + $0x110] sm:$0xff]   ;;  %v405_v2 = vld [vmem:[%s5286_s16 + $0x4] sm:$0xf] }
  0x23   : > { %4405 = vmatpush3.bf16.msra.mxu1 %v4886_v23  ;;  %v569_v17 = vor.u32 %v568_v10, %v564_v6  ;;  %v556_v23 = vrot.slane %v554_v19, 1  ;;  %v638_v39 = vshrl.u32 %v447_v9, 16  ;;  %v3897_v45 = vcombine.low %v5314_v48, %v5314_v48  ;;  %v4917_v48 = vld [vmem:[%s6214_s1 + $0x1a0] sm:$0xff]   ;;  %v5418_v6 = vld [vmem:[%s5286_s16 + $0xc] sm:$0xf] }
  0x24   : > { %4406 = vmatprep.subr.bf16.mxu1 %v4889_v26  ;;  %v545_v12 = vor.u32 %v544_v8, %v540_v1  ;;  %v3896_v26 = vcombine.low %v5295_v31, %v5298_v32  ;;  %v4910_v31 = vld [vmem:[%s6214_s1 + $0x168] sm:$0xff]   ;;  %v408_v7 = vld [vmem:[%s5286_s16 + $0x10] sm:$0x1]  ;;  %v409_v8 = vld [vmem:[%s5286_s16 + $0x4] sm:$0xc]  ;;  %v3898_v9 = vcombine.low %v405_v2, %v406_v3 }
  0x25   : > { %4379 = vmatpush3.bf16.msra.mxu0 %v4888_v25  ;;  %v574_v22 = vsel %vm426_vm0, %v569_v17, %v573_v11  ;;  %v4905_v25 = vld [vmem:[%s6214_s1 + $0x1b8] sm:$0xff]   ;;  %v640_v47 = vor.u32 %v638_v39, %v561_v24  ;;  %v470_v52 = vshrl.u32 %v3897_v45, 16  ;;  %v473_v55 = vshll.u32 %v3897_v45, 16  ;;  %v4927_v1 = vld [vmem:[%s6214_s1 + $0x108] sm:$0xff]   ;;  %v410_v10 = vld [vmem:[%s5286_s16 + $0x10] sm:$0x7] }
  0x26   : > { %4380 = vmatprep.subr.bf16.mxu0 %v4891_v28  ;;  %v550_v20 = vsel %vm426_vm0, %v545_v12, %v549_v4  ;;  %1189 = vmatprep.mubr.bf16.mxu1 %v574_v22  ;;  %v635_v28 = vshrl.u32 %v5322_v53, 16  ;;  %v411_v11 = vld [vmem:[%s5286_s16 + $0x4] sm:$0x8]  ;;  %v3899_v12 = vcombine.low %v5418_v6, %v408_v7  ;;  %v590_v19 = vshll.u32 %v3898_v9, 16  ;;  %v412_v2 = vld [vmem:[%s5286_s16 + $0x10] sm:$0xf] }
  0x27   : > { %4407 = vmatpush3.bf16.msra.mxu1 %v4890_v27  ;;  %1141 = vmatprep.mubr.bf16.mxu0 %v550_v20  ;;  %v4907_v27 = vld [vmem:[%s6214_s1 + $0x130] sm:$0xff]   ;;  %v472_v59 = vrot.slane %v470_v52, 7  ;;  %v4930_v15 = vld [vmem:[%s6214_s1 + $0x140] sm:$0xff]   ;;  %v5432_v17 = vcombine.low %v411_v11, %v406_v3  ;;  %v4929_v20 = vld [vmem:[%s6214_s1 + $0x188] sm:$0xff]  }
  0x28   : > { %4408 = vmatprep.subr.bf16.mxu1 %v4893_v30  ;;  %v4908_v30 = vld [vmem:[%s6214_s1 + $0x1f0] sm:$0xff]   ;;  %v637_v32 = vor.u32 %v635_v28, %v549_v4  ;;  %v595_v22 = vshll.u32 %v3899_v12, 16 }
  0x29   : > { %4381 = vmatpush3.bf16.msra.mxu0 %v4892_v29  ;;  %v557_v29 = vor.u32 %v556_v23, %v552_v18  ;;  %v475_v5 = vor.u32 %v473_v55, %v472_v59  ;;  %v588_v18 = vshrl.u32 %v3898_v9, 16  ;;  %v502_v28 = vshrl.u32 %v5432_v17, 16  ;;  %v4941_v52 = vld [vmem:[%s6214_s1 + $0x230] sm:$0xff]  }
  0x2a   : > { %4422 = vmatprep.subr.bf16.mxu0 %v4898_v44  ;;  %v466_v44 = vshll.u32 %v3896_v26, 16  ;;  %v505_v33 = vshll.u32 %v5432_v17, 16 }
  0x2b   : > { %4409 = vmatpush3.bf16.msra.mxu1 %v4896_v37  ;;  %v562_v34 = vsel %vm426_vm0, %v557_v29, %v561_v24  ;;  %v463_v37 = vshrl.u32 %v3896_v26, 16  ;;  %v4932_v24 = vld [vmem:[%s6214_s1 + $0x1c0] sm:$0xff]   ;;  %v592_v26 = vrot.slane %v590_v19, 1  ;;  %v597_v29 = vrot.slane %v595_v22, 1 }
  0x2c   : > { %4450 = vmatprep.subr.bf16.mxu1 %v4904_v50  ;;  %1142 = vmatmul.mubr.bf16.vlgmr.msra.gmra.mxu0 %v538_v16  ;;  %v4918_v50 = vld [vmem:[%s6214_s1 + $0x158] sm:$0xff]   ;;  %v3901_v16 = vcombine.low %v5418_v6, %v410_v10  ;;  %v507_v39 = vrot.slane %v505_v33, 3  ;;  %v4943_v10 = vld [vmem:[%s6214_s1 + $0x220] sm:$0xff]  }
  0x2d   : > { %4423 = vmatpush3.bf16.msra.mxu0 %v4902_v13  ;;  %1149 = vmatprep.mubr.bf16.mxu0 %v637_v32  ;;  %v5370_v43 = vrot.slane %v463_v37, 7  ;;  %v3900_v13 = vcombine.low %v409_v8, %v406_v3  ;;  %v593_v32 = vor.u32 %v592_v26, %v588_v18  ;;  %v521_v3 = vrot.slane %v5432_v17, 3  ;;  %v4944_v17 = vld [vmem:[%s6214_s1 + $0x218] sm:$0xff]   ;;  %v4947_v26 = vld [vmem:[%s6214_s1 + $0x200] sm:$0xff]  }
  0x2e   : > { %4424 = vmatprep.subr.bf16.mxu0 %v4906_v21  ;;  %1190 = vmatmul.mubr.bf16.vlgmr.msra.gmra.mxu1 %v562_v34  ;;  %v4931_v21 = vld [vmem:[%s6214_s1 + $0x100] sm:$0xff]   ;;  %v4940_v34 = vld [vmem:[%s6214_s1 + $0x238] sm:$0xff]   ;;  %v5450_v37 = vrot.slane %v3901_v16, 2 }
  0x2f   : > { %4451 = vmatpush3.bf16.msra.mxu1 %v4905_v25  ;;  %1197 = vmatprep.mubr.bf16.mxu1 %v643_v36  ;;  %v468_v51 = vor.u32 %v466_v44, %v5370_v43  ;;  %v494_v25 = vrot.slane %v3900_v13, 2  ;;  %v513_v36 = vshll.u32 %v3901_v16, 16  ;;  %v4952_v33 = vld [vmem:[%s6216_s3 + $0x38] sm:$0xff]  }
  0x30   : > { %4452 = vmatprep.subr.bf16.mxu1 %v4908_v30  ;;  %v650_v13 = vshrl.u32 %v5450_v37, 16 }
  0x31   : > { %4425 = vmatpush3.bf16.msra.mxu0 %v4907_v27  ;;  %v578_v58 = vshll.u32 %v468_v51, 16  ;;  %v576_v63 = vshrl.u32 %v468_v51, 16  ;;  %v476_v27 = vsel %vm461_vm4, %v5370_v43, %v475_v5  ;;  %v4938_v43 = vld [vmem:[%s6214_s1 + $0x180] sm:$0xff]   ;;  %v515_v44 = vrot.slane %v513_v36, 3  ;;  %v4957_v36 = vld [vmem:[%s6216_s3 + $0xe8] sm:$0xff]  }
  0x32   : > { %4426 = vmatprep.subr.bf16.mxu0 %v4910_v31  ;;  %v583_v30 = vshll.u32 %v476_v27, 16  ;;  %v510_v31 = vshrl.u32 %v3901_v16, 16  ;;  %v496_v45 = vsel %vm493_vm3, %v494_v25, %v5450_v37  ;;  %v3903_v5 = vcombine.low %v5418_v6, %v412_v2  ;;  %v4946_v25 = vld [vmem:[%s6214_s1 + $0x208] sm:$0xff]  }
  0x33   : > { %4453 = vmatpush3.bf16.msra.mxu1 %v4909_v35  ;;  %v580_v4 = vrot.slane %v578_v58, 1  ;;  %v504_v35 = vrot.slane %v502_v28, 2  ;;  %v600_v51 = vshrl.u32 %v496_v45, 16  ;;  %v4949_v28 = vld [vmem:[%s6216_s3 + $0xf8] sm:$0xff]  }
  0x34   : > { %1150 = vmatmul.mubr.bf16.gmra.mxu0 %v5322_v53  ;;  %4454 = vmatprep.subr.bf16.mxu1 %v4912_v40  ;;  %v4919_v53 = vld [vmem:[%s6214_s1 + $0x118] sm:$0xff]   ;;  %v512_v40 = vrot.slane %v510_v31, 2  ;;  %v522_v11 = vrot.slane %v3903_v5, 3  ;;  %v4953_v31 = vld [vmem:[%s6216_s3 + $0xf0] sm:$0xff]  }
  0x35   : > { %4427 = vmatpush3.bf16.msra.mxu0 %v4911_v38  ;;  %v581_v23 = vor.u32 %v580_v4, %v576_v63  ;;  %v585_v38 = vrot.slane %v583_v30, 1  ;;  %v4951_v30 = vld [vmem:[%s6216_s3 + $0x78] sm:$0xff]  }
  0x36   : > { %4428 = vmatprep.subr.bf16.mxu0 %v4914_v41  ;;  %1198 = vmatmul.mubr.bf16.gmra.mxu1 %v640_v47  ;;  %v647_v41 = vshrl.u32 %v3899_v12, 16  ;;  %v508_v47 = vor.u32 %v507_v39, %v504_v35  ;;  %v631_v6 = vshll.u32 %v522_v11, 16  ;;  %v656_v18 = vshrl.u32 %v522_v11, 16  ;;  %v4956_v35 = vld [vmem:[%s6216_s3 + $0x30] sm:$0xff]   ;;  %v4961_v39 = vld [vmem:[%s6216_s3 + $0xe0] sm:$0xff]  }
  0x37   : > { %4455 = vmatpush3.bf16.msra.mxu1 %v4913_v42  ;;  %v598_v42 = vsel %vm426_vm0, %v593_v32, %v597_v29  ;;  %v4954_v32 = vld [vmem:[%s6216_s3 + $0xb0] sm:$0xff]  }
  0x38   : > { %4456 = vmatprep.subr.bf16.mxu1 %v4916_v49  ;;  %v602_v49 = vshll.u32 %v496_v45, 16  ;;  %1237 = vmatprep.mubr.bf16.mxu0 %v598_v42  ;;  %v4963_v42 = vld [vmem:[%s6216_s3 + $0x60] sm:$0xff]  }
  0x39   : > { %4429 = vmatpush3.bf16.msra.mxu0 %v4915_v46  ;;  %v586_v46 = vsel %vm426_vm0, %v581_v23, %v585_v38  ;;  %v4964_v45 = vld [vmem:[%s6216_s3 + $0x20] sm:$0xff]  }
  0x3a   : > { %4430 = vmatprep.subr.bf16.mxu0 %v4918_v50  ;;  %v607_v50 = vshll.u32 %v5450_v37, 16  ;;  %v4958_v37 = vld [vmem:[%s6216_s3 + $0xa8] sm:$0xff]  }
  0x3b   : > { %4457 = vmatpush3.bf16.msra.mxu1 %v4917_v48  ;;  %v516_v48 = vor.u32 %v515_v44, %v512_v40  ;;  %v5145_v40 = vmov 0   ;;  %v4965_v44 = vld [vmem:[%s6216_s3 + $0xd8] sm:$0xff]  }
  0x3c   : > { %4458 = vmatprep.subr.bf16.mxu1 %v4920_v54  ;;  %v604_v54 = vrot.slane %v602_v49, 1  ;;  %1349 = vst [vmem:[#allocation2] sm:$0xf] %v5145_v40  ;;  %1350 = vst [vmem:[#allocation2 + $0x10] sm:$0xf] %v5145_v40  ;;  %v4968_v49 = vld [vmem:[%s6216_s3 + $0x18] sm:$0xff]  }
  0x3d   : > { %4431 = vmatpush3.bf16.msra.mxu0 %v4919_v53  ;;  %v649_v53 = vor.u32 %v647_v41, %v597_v29  ;;  %v517_v55 = vsel %vm500_vm5, %v508_v47, %v516_v48  ;;  %v4950_v29 = vld [vmem:[%s6216_s3 + $0xb8] sm:$0xff]   ;;  %v4960_v41 = vld [vmem:[%s6216_s3 + $0x28] sm:$0xff]  }
  0x3e   : > { %4432 = vmatprep.subr.bf16.mxu0 %v4922_v56  ;;  %v619_v56 = vshll.u32 %v516_v48, 16  ;;  %v612_v58 = vshrl.u32 %v517_v55, 16  ;;  %v614_v59 = vshll.u32 %v517_v55, 16  ;;  %v605_v63 = vor.u32 %v604_v54, %v600_v51  ;;  %v4967_v47 = vld [vmem:[%s6216_s3 + $0x58] sm:$0xff]   ;;  %v4971_v51 = vld [vmem:[%s6216_s3 + $0x50] sm:$0xff]   ;;  %v4975_v54 = vld [vmem:[%s6216_s3 + $0x48] sm:$0xff]  }
  0x3f   : > { %4459 = vmatpush3.bf16.msra.mxu1 %v4921_v57  ;;  %v644_v57 = vshrl.u32 %v476_v27, 16  ;;  %v4974_v55 = vld [vmem:[%s6216_s3 + $0x88] sm:$0xff]  }
  0x40   : > { %4460 = vmatprep.subr.bf16.mxu1 %v4924_v61  ;;  %v4942_v61 = vld [vmem:[%s6214_s1 + $0x228] sm:$0xff]  }
  0x41   : > { %4433 = vmatpush3.bf16.msra.mxu0 %v4923_v60  ;;  %v609_v60 = vrot.slane %v607_v50, 1  ;;  %v646_v4 = vor.u32 %v644_v57, %v585_v38  ;;  %v4959_v38 = vld [vmem:[%s6216_s3 + $0x68] sm:$0xff]   ;;  %v4969_v50 = vld [vmem:[%s6216_s3 + $0xd0] sm:$0xff]  }
  0x42   : > { %4434 = vmatprep.subr.bf16.mxu0 %v4926_v62  ;;  %v621_v62 = vrot.slane %v619_v56, 1  ;;  %v4977_v56 = vld [vmem:[%s6216_s3 + $0xc0] sm:$0xff]   ;;  %v4976_v57 = vld [vmem:[%s6216_s3 + $0x8] sm:$0xff]  }
  0x43   : > { %4461 = vmatpush3.bf16.msra.mxu1 %v4925_v0  ;;  %v653_v0 = vshrl.u32 %v516_v48, 16  ;;  %v610_v8 = vsel %vm426_vm0, %v605_v63, %v609_v60  ;;  %v652_v22 = vor.u32 %v650_v13, %v609_v60  ;;  %v4970_v48 = vld [vmem:[%s6216_s3 + $0x90] sm:$0xff]   ;;  %v4984_v60 = vld [vmem:[%s6216_s3 + $0x1f8] sm:$0xff]  }
  0x44   : > { %4462 = vmatprep.subr.bf16.mxu1 %v4928_v14  ;;  %v523_v14 = vsel %vm455_vm1, %v521_v3, %v522_v11 }
  0x45   : > { %4435 = vmatpush3.bf16.msra.mxu0 %v4927_v1  ;;  %v616_v1 = vrot.slane %v614_v59, 1  ;;  %v655_v9 = vor.u32 %v653_v0, %v621_v62  ;;  %v626_v16 = vshll.u32 %v523_v14, 16  ;;  %v4978_v59 = vld [vmem:[%s6216_s3 + $0x80] sm:$0xff]  }
  0x46   : > { %4436 = vmatprep.subr.bf16.mxu0 %v4930_v15  ;;  %v624_v15 = vshrl.u32 %v523_v14, 16 }
  0x47   : > { %4463 = vmatpush3.bf16.msra.mxu1 %v4929_v20  ;;  %v617_v7 = vor.u32 %v616_v1, %v612_v58  ;;  %v628_v19 = vrot.slane %v626_v16, 1  ;;  %v633_v20 = vrot.slane %v631_v6, 1  ;;  %v4979_v58 = vld [vmem:[%s6216_s3 + $0x40] sm:$0xff]  }
  0x48   : > { %4464 = vmatprep.subr.bf16.mxu1 %v4932_v24 }
  0x49   : > { %4437 = vmatpush3.bf16.msra.mxu0 %v4931_v21  ;;  %v622_v12 = vsel %vm426_vm0, %v617_v7, %v621_v62  ;;  %v4945_v21 = vld [vmem:[%s6214_s1 + $0x210] sm:$0xff]   ;;  %v629_v23 = vor.u32 %v628_v19, %v624_v15  ;;  %v658_v27 = vor.u32 %v656_v18, %v633_v20  ;;  %v4989_v62 = vld [vmem:[%s6216_s3 + $0x178] sm:$0xff]  }
  0x4a   : > { %4752 = vmatprep.subr.bf16.mxu0 %v4940_v34  ;;  %1285 = vmatprep.mubr.bf16.mxu1 %v622_v12 }
  0x4b   : > { %4465 = vmatpush3.bf16.msra.mxu1 %v4938_v43  ;;  %v634_v24 = vsel %vm426_vm0, %v629_v23, %v633_v20  ;;  %v4962_v43 = vld [vmem:[%s6216_s3 + $0xa0] sm:$0xff]  }
  0x4c   : > { %1238 = vmatmul.mubr.bf16.vlgmr.msra.gmra.mxu0 %v586_v46  ;;  %4488 = vmatprep.subr.bf16.mxu1 %v4951_v30  ;;  %v4966_v46 = vld [vmem:[%s6216_s3 + $0x98] sm:$0xff]  }
  0x4d   : > { %4753 = vmatpush3.bf16.msra.mxu0 %v4940_v34  ;;  %1245 = vmatprep.mubr.bf16.mxu0 %v649_v53  ;;  %v4955_v34 = vld [vmem:[%s6216_s3 + $0x70] sm:$0xff]  }
  0x4e   : > { %4754 = vmatprep.subr.bf16.mxu0 %v4941_v52  ;;  %1286 = vmatmul.mubr.bf16.vlgmr.msra.gmra.mxu1 %v610_v8  ;;  %v4972_v53 = vld [vmem:[%s6216_s3 + $0x10] sm:$0xff]  }
  0x4f   : > { %1293 = vmatprep.mubr.bf16.mxu1 %v655_v9  ;;  %4489 = vmatpush3.bf16.msra.mxu1 %v4952_v33 }
  0x50   : > { %4490 = vmatprep.subr.bf16.mxu1 %v4955_v34 }
  0x51   : > { %4755 = vmatpush3.bf16.msra.mxu0 %v4941_v52  ;;  %v4973_v52 = vld [vmem:[%s6216_s3 + $0xc8] sm:$0xff]  }
  0x52   : > { %4756 = vmatprep.subr.bf16.mxu0 %v4942_v61 }
  0x53   : > { %4491 = vmatpush3.bf16.msra.mxu1 %v4956_v35 }
  0x54   : > { %1246 = vmatmul.mubr.bf16.gmra.mxu0 %v646_v4  ;;  %4492 = vmatprep.subr.bf16.mxu1 %v4959_v38 }
  0x55   : > { %4757 = vmatpush3.bf16.msra.mxu0 %v4942_v61  ;;  %4768 = vmatprep.mubr.bf16.mxu0 %v634_v24  ;;  %v4980_v61 = vld [vmem:[%s6216_s3] sm:$0xff]  }
  0x56   : > { %4758 = vmatprep.subr.bf16.mxu0 %v4943_v10  ;;  %1294 = vmatmul.mubr.bf16.gmra.mxu1 %v652_v22 }
  0x57   : > { %4493 = vmatpush3.bf16.msra.mxu1 %v4960_v41 }
  0x58   : > { %4494 = vmatprep.subr.bf16.mxu1 %v4963_v42 }
  0x59   : > { %4759 = vmatpush3.bf16.msra.mxu0 %v4943_v10 }
  0x5a   : > { %4760 = vmatprep.subr.bf16.mxu0 %v4944_v17 }
  0x5b   : > { %4495 = vmatpush3.bf16.msra.mxu1 %v4964_v45 }
  0x5c   : > { %4496 = vmatprep.subr.bf16.mxu1 %v4967_v47 }
  0x5d   : > { %4761 = vmatpush3.bf16.msra.mxu0 %v4944_v17 }
  0x5e   : > { %4762 = vmatprep.subr.bf16.mxu0 %v4945_v21 }
  0x5f   : > { %4497 = vmatpush3.bf16.msra.mxu1 %v4968_v49 }
  0x60   : > { %4498 = vmatprep.subr.bf16.mxu1 %v4971_v51 }
  0x61   : > { %4763 = vmatpush3.bf16.msra.mxu0 %v4945_v21 }
  0x62   : > { %4764 = vmatprep.subr.bf16.mxu0 %v4946_v25 }
  0x63   : > { %4499 = vmatpush3.bf16.msra.mxu1 %v4972_v53 }
  0x64   : > { %4500 = vmatprep.subr.bf16.mxu1 %v4975_v54 }
  0x65   : > { %4765 = vmatpush3.bf16.msra.mxu0 %v4946_v25 }
  0x66   : > { %4766 = vmatprep.subr.bf16.mxu0 %v4947_v26 }
  0x67   : > { %4501 = vmatpush3.bf16.msra.mxu1 %v4976_v57 }
  0x68   : > { %4502 = vmatprep.subr.bf16.mxu1 %v4979_v58 }
  0x69   : > { %4767 = vmatpush3.bf16.msra.mxu0 %v4947_v26 }
  0x6a   : > { %4516 = vmatprep.subr.bf16.mxu0 %v4949_v28 }
  0x6b   : > { %4503 = vmatpush3.bf16.msra.mxu1 %v4980_v61 }
  0x6c   : > { %4769 = vmatmul.mubr.bf16.vlgmr.msra.gmra.mxu0 %v658_v27  ;;  %4544 = vmatprep.subr.bf16.mxu1 %v4989_v62 }
  0x6d   : > { %4517 = vmatpush3.bf16.msra.mxu0 %v4950_v29  ;;  %v3904_v29 = vld [vmem:[%s6215_s2] ss:$0 sm:$0xff] }
  0x6e   : > { %4518 = vmatprep.subr.bf16.mxu0 %v4953_v31 }
  0x71   : > { %4519 = vmatpush3.bf16.msra.mxu0 %v4954_v32 }
  0x72   : > { %4520 = vmatprep.subr.bf16.mxu0 %v4957_v36 }
  0x75   : > { %4521 = vmatpush3.bf16.msra.mxu0 %v4958_v37 }
  0x76   : > { %4522 = vmatprep.subr.bf16.mxu0 %v4961_v39 }
  0x79   : > { %4523 = vmatpush3.bf16.msra.mxu0 %v4962_v43 }
  0x7a   : > { %4524 = vmatprep.subr.bf16.mxu0 %v4965_v44 }
  0x7d   : > { %4525 = vmatpush3.bf16.msra.mxu0 %v4966_v46 }
  0x7e   : > { %4526 = vmatprep.subr.bf16.mxu0 %v4969_v50 }
  0x81   : > { %4527 = vmatpush3.bf16.msra.mxu0 %v4970_v48 }
  0x82   : > { %4528 = vmatprep.subr.bf16.mxu0 %v4973_v52  ;;  %v5598_v52 = vld [vmem:[%s6218_s5] sm:$0xff]  }
  0x83   : > { %v4347_v61 = vunpack.c.l.bf16 %v5598_v52 }
  0x85   : > { %4529 = vmatpush3.bf16.msra.mxu0 %v4974_v55 }
  0x86   : > { %4530 = vmatprep.subr.bf16.mxu0 %v4977_v56 }
  0x89   : > { %4531 = vmatpush3.bf16.msra.mxu0 %v4978_v59  ;;  %v5605_v59 = vld [vmem:[%s6218_s5 + $0x8] sm:$0xf] }
  0x8a   : > { %4572 = vmatprep.subr.bf16.mxu0 %v4984_v60 }
  0xec   : > { %v4382_v63 = vpop.f32.mrf.mxu0 }
  0xee   : > { %v4383_v0 = vpop.f32.mrf.mxu0  ;;  %v4410_v1 = vpop.f32.mrf.mxu1 }
  0xef   : > { %v4384_v28 = vadd.f32 %v4383_v0, %v4382_v63 }
  0xf0   : > { %v4385_v2 = vpop.f32.mrf.mxu0  ;;  %v4411_v3 = vpop.f32.mrf.mxu1 }
  0xf1   : > { %v1144_v32 = vadd.f32 %v4384_v28, %v3904_v29  ;;  %v4412_v34 = vadd.f32 %v4411_v3, %v4410_v1  ;;  %v1359_v1 = vunpack.c.l.bf16 %v5605_v59 }
  0xf2   : > { %v4386_v4 = vpop.f32.mrf.mxu0  ;;  %v4413_v5 = vpop.f32.mrf.mxu1 }
  0xf3   : > { %v4387_v35 = vadd.f32 %v4386_v4, %v4385_v2  ;;  %v1192_v41 = vadd.f32 %v4412_v34, %v1144_v32 }
  0xf4   : > { %v4388_v7 = vpop.f32.mrf.mxu0  ;;  %v4414_v8 = vpop.f32.mrf.mxu1 }
  0xf5   : > { %v1147_v42 = vadd.f32 %v4387_v35, %v3904_v29  ;;  %v4415_v43 = vadd.f32 %v4414_v8, %v4413_v5 }
  0xf6   : > { %v4389_v9 = vpop.f32.mrf.mxu0  ;;  %v4416_v11 = vpop.f32.mrf.mxu1 }
  0xf7   : > { %v4390_v30 = vadd.f32 %v4389_v9, %v4388_v7  ;;  %v1195_v48 = vadd.f32 %v4415_v43, %v1147_v42  ;;  %v4348_v7 = vunpack.c.h.bf16 %v5598_v52 }
  0xf8   : > { %v4391_v10 = vpop.f32.mrf.mxu0  ;;  %v4417_v13 = vpop.f32.mrf.mxu1 }
  0xf9   : > { %v1152_v36 = vadd.f32 %v4390_v30, %v3904_v29  ;;  %v4418_v37 = vadd.f32 %v4417_v13, %v4416_v11  ;;  %v1527_v13 = vld [vmem:[#allocation2] sm:$0xe] }
  0xfa   : > { %v4392_v12 = vpop.f32.mrf.mxu0  ;;  %v4419_v14 = vpop.f32.mrf.mxu1 }
  0xfb   : > { %v1200_v44 = vadd.f32 %v4418_v37, %v1152_v36  ;;  %v1529_v14 = vld [vmem:[#allocation2] sm:$0x8] }
  0xfc   : > { %v4420_v6 = vpop.f32.mrf.mxu1 }
 0x10c   : > { %v4438_v15 = vpop.f32.mrf.mxu0 }
 0x10e   : > { %v4439_v16 = vpop.f32.mrf.mxu0  ;;  %v4466_v20 = vpop.f32.mrf.mxu1 }
 0x10f   : > { %v4440_v39 = vadd.f32 %v4439_v16, %v4438_v15  ;;  %v1523_v15 = vld [vmem:[#allocation2] sm:$0xf] }
 0x110   : > { %v4441_v17 = vpop.f32.mrf.mxu0  ;;  %v4467_v22 = vpop.f32.mrf.mxu1 }
 0x111   : > { %v1240_v45 = vadd.f32 %v4440_v39, %v1192_v41  ;;  %v4468_v46 = vadd.f32 %v4467_v22, %v4466_v20 }
 0x112   : > { %v4442_v18 = vpop.f32.mrf.mxu0  ;;  %v4469_v24 = vpop.f32.mrf.mxu1 }
 0x113   : > { %v4443_v47 = vadd.f32 %v4442_v18, %v4441_v17  ;;  %v1288_v56 = vadd.f32 %v4468_v46, %v1240_v45 }
 0x114   : > { %v4444_v19 = vpop.f32.mrf.mxu0  ;;  %v4470_v26 = vpop.f32.mrf.mxu1 }
 0x115   : > { %v1243_v53 = vadd.f32 %v4443_v47, %v1195_v48  ;;  %v4471_v54 = vadd.f32 %v4470_v26, %v4469_v24 }
 0x116   : > { %v4445_v21 = vpop.f32.mrf.mxu0  ;;  %v4472_v27 = vpop.f32.mrf.mxu1 }
 0x117   : > { %v4446_v40 = vadd.f32 %v4445_v21, %v4444_v19  ;;  %v1291_v0 = vadd.f32 %v4471_v54, %v1243_v53 }
 0x118   : > { %v4447_v23 = vpop.f32.mrf.mxu0  ;;  %v4473_v33 = vpop.f32.mrf.mxu1 }
 0x119   : > { %v1248_v49 = vadd.f32 %v4446_v40, %v1200_v44  ;;  %v4474_v50 = vadd.f32 %v4473_v33, %v4472_v27 }
 0x11a   : > { %v4448_v25 = vpop.f32.mrf.mxu0  ;;  %v4475_v31 = vpop.f32.mrf.mxu1 }
 0x11b   : > { %v1296_v55 = vadd.f32 %v4474_v50, %v1248_v49 }
 0x11c   : > { %v4476_v38 = vpop.f32.mrf.mxu1 }
 0x11d   : > { %v1536_v38 = vld [vmem:[#allocation2 + $0x10] sm:$0x7] }
 0x12c   : > { %v4770_v51 = vpop.f32.mrf.mxu0 }
 0x12d   : > { %v5600_v58 = vadd.f32 %v4770_v51, %v1296_v55 }
 0x12e   : > { %v1335_v57 = vpop.f32.mrf.mxu0 }
 0x12f   : > { %v5607_v60 = vadd.f32 %v1335_v57, %v1288_v56  ;;  %v1356_v3 = vmax.f32 %v5600_v58, 0.0 }
 0x130   : > { %v4771_v62 = vpop.f32.mrf.mxu0 }
 0x131   : > { %v1354_v63 = vmax.f32 %v5607_v60, 0.0  ;;  %v1362_v10 = vmul.f32 %v1359_v1, %v1356_v3 }
 0x132   : > { %v1338_v2 = vpop.f32.mrf.mxu0 }
 0x133   : > { %v1360_v4 = vmul.f32 %v4347_v61, %v1354_v63  ;;  %v5615_v5 = vadd.f32 %v1338_v2, %v1291_v0 }
 0x135   : > { %v4336_v8 = vpack.c.bf16 %v1360_v4, %v1360_v4  ;;  %v1355_v9 = vmax.f32 %v5615_v5, 0.0 }
 0x137   : > { %1376 = vst [vmem:[#allocation2 + $0x4] sm:$0xf] %v4336_v8  ;;  %v1361_v11 = vmul.f32 %v4348_v7, %v1355_v9  ;;  %v4987_v9 = vld [vmem:[%s6216_s3 + $0x1b8] sm:$0xff]  }
 0x139   : > { %v4352_v12 = vpack.c.bf16 %v1362_v10, %v1361_v11 }
 0x13b   : > { %4364 = vst [vmem:[#allocation2 + $0x8] sm:$0xff] %v4352_v12  }
 0x13e   : > { %v5623_v6 = vld [vmem:[#allocation2 + $0x4] sm:$0xf] }
 0x13f   : > { %v3982_v16 = vcombine.low %v1527_v13, %v5623_v6  ;;  %v3984_v17 = vcombine.low %v1529_v14, %v5623_v6  ;;  %v5628_v19 = vcombine.low %v1523_v15, %v5623_v6  ;;  %v1537_v35 = vld [vmem:[#allocation2 + $0x4] sm:$0x8] }
 0x141   : > { %v1555_v18 = vshll.u32 %v3982_v16, 16  ;;  %v1579_v28 = vrot.slane %v3984_v17, 3  ;;  %v1570_v29 = vrot.slane %v3982_v16, 1  ;;  %v1553_v32 = vshrl.u32 %v3982_v16, 16  ;;  %v4992_v17 = vld [vmem:[%s6216_s3 + $0x1f0] sm:$0xff]  }
 0x142   : > { %v5630_v20 = vld [vmem:[#allocation2 + $0x8] sm:$0xf]  ;;  %v5632_v21 = vld [vmem:[#allocation2 + $0xc] sm:$0xf]  ;;  %v1647_v34 = vshll.u32 %v5628_v19, 16  ;;  %v1645_v13 = vshrl.u32 %v5628_v19, 16 }
 0x143   : > { %v1528_v22 = vld [vmem:[#allocation2 + $0xc] sm:$0x3]  ;;  %v3985_v23 = vcombine.low %v5630_v20, %v5632_v21  ;;  %v1557_v26 = vrot.slane %v1555_v18, 1  ;;  %v5637_v27 = vld [vmem:[#allocation2 + $0x8] sm:$0xf] }
 0x144   : > { %v3983_v24 = vcombine.low %v5630_v20, %v1528_v22  ;;  %v1526_v25 = vld [vmem:[#allocation2 + $0xc] sm:$0x1]  ;;  %v5646_v39 = vcombine.low %v1537_v35, %v5637_v27  ;;  %v1649_v48 = vrot.slane %v1647_v34, 1 }
 0x145   : > { %v3981_v30 = vcombine.low %v5630_v20, %v1526_v25  ;;  %v1580_v33 = vrot.slane %v3985_v23, 3  ;;  %v5643_v37 = vld [vmem:[#allocation2 + $0xc] sm:$0xf]  ;;  %v1558_v43 = vor.u32 %v1557_v26, %v1553_v32  ;;  %v1531_v26 = vld [vmem:[#allocation2 + $0x4] sm:$0xf] }
 0x146   : > { %v5640_v31 = vrot.slane %v3983_v24, 1  ;;  %v5653_v51 = vcombine.low %v5643_v37, %v1536_v38  ;;  %v1622_v0 = vshrl.u32 %v5646_v39, 16  ;;  %v1625_v23 = vshll.u32 %v5646_v39, 16 }
 0x147   : > { %v1560_v36 = vshll.u32 %v3981_v30, 16  ;;  %v1581_v40 = vsel %vm455_vm1, %v1579_v28, %v1580_v33  ;;  %v1684_v41 = vshll.u32 %v1580_v33, 16  ;;  %v1564_v47 = vshrl.u32 %v3981_v30, 16 }
 0x148   : > { %v1572_v42 = vsel %vm445_vm2, %v1570_v29, %v5640_v31  ;;  %v1679_v44 = vshll.u32 %v1581_v40, 16  ;;  %v1672_v46 = vshll.u32 %v5640_v31, 16  ;;  %v1677_v53 = vshrl.u32 %v1581_v40, 16  ;;  %v1534_v29 = vld [vmem:[#allocation2 + $0x10] sm:$0x1] }
 0x149   : > { %v1667_v45 = vshll.u32 %v1572_v42, 16  ;;  %v1686_v49 = vrot.slane %v1684_v41, 1  ;;  %v1562_v50 = vrot.slane %v1560_v36, 1  ;;  %v1665_v55 = vshrl.u32 %v1572_v42, 16  ;;  %v4993_v41 = vld [vmem:[%s6216_s3 + $0x1b0] sm:$0xff]  }
 0x14a   : > { %v1681_v54 = vrot.slane %v1679_v44, 1  ;;  %v1754_v63 = vshrl.u32 %v1580_v33, 16  ;;  %v1674_v4 = vrot.slane %v1672_v46, 1  ;;  %v1624_v18 = vrot.slane %v1622_v0, 2  ;;  %v4991_v33 = vld [vmem:[%s6216_s3 + $0x138] sm:$0xff]   ;;  %v4994_v42 = vld [vmem:[%s6216_s3 + $0x170] sm:$0xff]  }
 0x14b   : > { %v1669_v56 = vrot.slane %v1667_v45, 1  ;;  %v1563_v57 = vsel %vm426_vm0, %v1558_v43, %v1562_v50  ;;  %v5656_v62 = vor.u32 %v1564_v47, %v1562_v50  ;;  %v1630_v24 = vshrl.u32 %v5653_v51, 16  ;;  %v4996_v45 = vld [vmem:[%s6216_s3 + $0x1e8] sm:$0xff]  }
 0x14c   : > { %v1682_v2 = vor.u32 %v1681_v54, %v1677_v53  ;;  %v1655_v8 = vshll.u32 %v1563_v57, 16  ;;  %v1653_v10 = vshrl.u32 %v1563_v57, 16  ;;  %v1756_v12 = vor.u32 %v1754_v63, %v1686_v49 }
 0x14d   : > { %v1670_v3 = vor.u32 %v1669_v56, %v1665_v55  ;;  %v1660_v11 = vshll.u32 %v5656_v62, 16  ;;  %v1633_v25 = vshll.u32 %v5653_v51, 16  ;;  %v1650_v28 = vor.u32 %v1649_v48, %v1645_v13  ;;  %v4995_v48 = vld [vmem:[%s6216_s3 + $0x130] sm:$0xff]   ;;  %v4997_v56 = vld [vmem:[%s6216_s3 + $0x1a8] sm:$0xff]  }
 0x14e   : > { %v1687_v14 = vsel %vm426_vm0, %v1682_v2, %v1686_v49  ;;  %v1657_v16 = vrot.slane %v1655_v8, 1  ;;  %v3988_v30 = vcombine.low %v1531_v26, %v5637_v27  ;;  %v1748_v32 = vshrl.u32 %v5656_v62, 16 }
 0x14f   : > { %v1675_v15 = vsel %vm426_vm0, %v1670_v3, %v1674_v4  ;;  %2302 = vmatprep.mubr.bf16.mxu0 %v1687_v14  ;;  %v1662_v22 = vrot.slane %v1660_v11, 1  ;;  %v1627_v34 = vrot.slane %v1625_v23, 3  ;;  %v1632_v35 = vrot.slane %v1630_v24, 2  ;;  %v5004_v3 = vld [vmem:[%s6216_s3 + $0x1e0] sm:$0xff]  }
 0x150   : > { %2303 = vmatmul.mubr.bf16.vlgmr.msra.gmra.mxu0 %v1675_v15  ;;  %v1658_v19 = vor.u32 %v1657_v16, %v1653_v10  ;;  %v1635_v36 = vrot.slane %v1633_v25, 3  ;;  %v1651_v40 = vsel %vm426_vm0, %v1650_v28, %v1562_v50  ;;  %v1703_v43 = vshll.u32 %v3988_v30, 16  ;;  %v1535_v11 = vld [vmem:[#allocation2 + $0x4] sm:$0xc]  ;;  %v5012_v28 = vld [vmem:[%s6216_s3 + $0x1d0] sm:$0xff]  }
 0x151   : > { %4573 = vmatpush3.bf16.msra.mxu0 %v4987_v9  ;;  %2310 = vmatprep.mubr.bf16.mxu0 %v1756_v12  ;;  %v1750_v44 = vor.u32 %v1748_v32, %v1662_v22  ;;  %v1628_v46 = vor.u32 %v1627_v34, %v1624_v18  ;;  %v5691_v49 = vcombine.low %v5643_v37, %v1534_v29  ;;  %v1751_v50 = vshrl.u32 %v5640_v31, 16  ;;  %v4998_v31 = vld [vmem:[%s6216_s3 + $0x168] sm:$0xff]   ;;  %v5007_v24 = vld [vmem:[%s6216_s3 + $0x120] sm:$0xff]   ;;  %v5013_v34 = vld [vmem:[%s6216_s3 + $0x190] sm:$0xff]  }
 0x152   : > { %v1663_v38 = vsel %vm426_vm0, %v1658_v19, %v1662_v22  ;;  %4574 = vmatprep.subr.bf16.mxu0 %v4992_v17  ;;  %v5688_v47 = vor.u32 %v1635_v36, %v1632_v35  ;;  %v1705_v54 = vrot.slane %v1703_v43, 1  ;;  %v1701_v0 = vshrl.u32 %v3988_v30, 16  ;;  %v5001_v12 = vld [vmem:[%s6216_s3 + $0x128] sm:$0xff]   ;;  %v5009_v19 = vld [vmem:[%s6216_s3 + $0x198] sm:$0xff]   ;;  %v5014_v35 = vld [vmem:[%s6216_s3 + $0x150] sm:$0xff]  }
 0x153   : > { %2254 = vmatprep.mubr.bf16.mxu1 %v1663_v38  ;;  %v1753_v55 = vor.u32 %v1751_v50, %v1674_v4  ;;  %v1708_v2 = vshll.u32 %v5691_v49, 16  ;;  %v3986_v4 = vcombine.low %v5623_v6, %v5630_v20  ;;  %v3987_v8 = vcombine.low %v5632_v21, %v5632_v21  ;;  %v5005_v6 = vld [vmem:[%s6216_s3 + $0x1a0] sm:$0xff]   ;;  %v1538_v38 = vld [vmem:[#allocation2 + $0x10] sm:$0xf]  ;;  %v5018_v50 = vld [vmem:[%s6216_s3 + $0x148] sm:$0xff]  }
 0x154   : > { %2255 = vmatmul.mubr.bf16.vlgmr.msra.gmra.mxu1 %v1651_v40  ;;  %v1637_v53 = vsel %vm500_vm5, %v1628_v46, %v5688_v47  ;;  %v1732_v63 = vshll.u32 %v5688_v47, 16  ;;  %v1706_v13 = vor.u32 %v1705_v54, %v1701_v0  ;;  %v3990_v14 = vcombine.low %v1535_v11, %v5637_v27  ;;  %v5006_v21 = vld [vmem:[%s6216_s3 + $0x160] sm:$0xff]   ;;  %v5008_v27 = vld [vmem:[%s6216_s3 + $0x1d8] sm:$0xff]   ;;  %v5016_v40 = vld [vmem:[%s6216_s3 + $0x1c8] sm:$0xff]  }
 0x155   : > { %4545 = vmatpush3.bf16.msra.mxu1 %v4991_v33  ;;  %2262 = vmatprep.mubr.bf16.mxu1 %v1750_v44  ;;  %v1727_v57 = vshll.u32 %v1637_v53, 16  ;;  %v1725_v9 = vshrl.u32 %v1637_v53, 16  ;;  %v5723_v20 = vrot.slane %v1708_v2, 1  ;;  %v1585_v17 = vshrl.u32 %v3986_v4, 16  ;;  %v5015_v44 = vld [vmem:[%s6216_s3 + $0x110] sm:$0xff]   ;;  %v5017_v46 = vld [vmem:[%s6216_s3 + $0x188] sm:$0xff]  }
 0x156   : > { %4575 = vmatpush3.bf16.msra.mxu0 %v4993_v41  ;;  %4546 = vmatprep.subr.bf16.mxu1 %v4994_v42  ;;  %v5718_v16 = vrot.slane %v1732_v63, 1  ;;  %v1592_v18 = vshrl.u32 %v3987_v8, 16  ;;  %v1615_v25 = vrot.slane %v3990_v14, 2  ;;  %v5740_v26 = vrot.slane %v5653_v51, 2  ;;  %v5011_v51 = vld [vmem:[%s6216_s3 + $0x118] sm:$0xff]   ;;  %v5022_v63 = vld [vmem:[%s6216_s3 + $0x140] sm:$0xff]  }
 0x157   : > { %4576 = vmatprep.subr.bf16.mxu0 %v4996_v45  ;;  %v1729_v10 = vrot.slane %v1727_v57, 1  ;;  %v1711_v23 = vsel %vm426_vm0, %v1706_v13, %v5723_v20  ;;  %v1587_v29 = vrot.slane %v1585_v17, 7  ;;  %v1588_v32 = vshll.u32 %v3986_v4, 16  ;;  %v5021_v57 = vld [vmem:[%s6216_s3 + $0x180] sm:$0xff]   ;;  %v5026_v13 = vld [vmem:[%s6216_s3 + $0x238] sm:$0xff]  }
 0x158   : > { %2311 = vmatmul.mubr.bf16.gmra.mxu0 %v1753_v55  ;;  %v1594_v30 = vrot.slane %v1592_v18, 7  ;;  %v1617_v33 = vsel %vm493_vm3, %v1615_v25, %v5740_v26  ;;  %v1595_v36 = vshll.u32 %v3987_v8, 16  ;;  %v3993_v45 = vcombine.low %v5643_v37, %v1538_v38  ;;  %v5019_v37 = vld [vmem:[%s6216_s3 + $0x108] sm:$0xff]   ;;  %v5035_v38 = vld [vmem:[%s6217_s4 + $0x38] sm:$0xff]  }
 0x159   : > { %4547 = vmatpush3.bf16.msra.mxu1 %v4995_v48  ;;  %v1730_v15 = vor.u32 %v1729_v10, %v1725_v9  ;;  %v1590_v41 = vor.u32 %v1588_v32, %v1587_v29  ;;  %v1715_v42 = vshll.u32 %v1617_v33, 16  ;;  %v5020_v48 = vld [vmem:[%s6216_s3 + $0x1c0] sm:$0xff]   ;;  %v1713_v0 = vshrl.u32 %v1617_v33, 16  ;;  %v5032_v33 = vld [vmem:[%s6216_s3 + $0x210] sm:$0xff]   ;;  %v5033_v32 = vld [vmem:[%s6216_s3 + $0x208] sm:$0xff]  }
 0x15a   : > { %4577 = vmatpush3.bf16.msra.mxu0 %v4997_v56  ;;  %4548 = vmatprep.subr.bf16.mxu1 %v4998_v31  ;;  %v1597_v43 = vor.u32 %v1595_v36, %v1594_v30  ;;  %v1641_v56 = vrot.slane %v5646_v39, 3  ;;  %v5783_v31 = vrot.slane %v3993_v45, 3  ;;  %v1720_v2 = vshll.u32 %v5740_v26, 16  ;;  %v5023_v39 = vld [vmem:[%s6216_s3 + $0x100] sm:$0xff]   ;;  %v5041_v45 = vld [vmem:[%s6217_s4 + $0x8] sm:$0xff]  }
 0x15b   : > { %4578 = vmatprep.subr.bf16.mxu0 %v5004_v3  ;;  %v1735_v22 = vsel %vm426_vm0, %v1730_v15, %v5718_v16  ;;  %v1691_v53 = vshll.u32 %v1590_v41, 16  ;;  %v1717_v54 = vrot.slane %v1715_v42, 1  ;;  %v1689_v9 = vshrl.u32 %v1590_v41, 16  ;;  %v5037_v41 = vld [vmem:[%s6217_s4 + $0x28] sm:$0xff]   ;;  %v5038_v42 = vld [vmem:[%s6217_s4 + $0x20] sm:$0xff]  }
 0x15c   : > { %2263 = vmatmul.mubr.bf16.gmra.mxu1 %v5656_v62  ;;  %2398 = vmatprep.mubr.bf16.mxu0 %v1735_v22  ;;  %v5010_v62 = vld [vmem:[%s6216_s3 + $0x158] sm:$0xff]   ;;  %v1598_v55 = vsel %vm461_vm4, %v1587_v29, %v1597_v43  ;;  %v1643_v10 = vsel %vm455_vm1, %v1641_v56, %v5783_v31  ;;  %v1722_v11 = vrot.slane %v1720_v2, 1  ;;  %v1760_v17 = vshrl.u32 %v5691_v49, 16  ;;  %v5028_v49 = vld [vmem:[%s6216_s3 + $0x228] sm:$0xff]  }
 0x15d   : > { %4549 = vmatpush3.bf16.msra.mxu1 %v5001_v12  ;;  %2350 = vmatprep.mubr.bf16.mxu1 %v1711_v23  ;;  %v1693_v3 = vrot.slane %v1691_v53, 1  ;;  %v1696_v4 = vshll.u32 %v1598_v55, 16  ;;  %v1718_v8 = vor.u32 %v1717_v54, %v1713_v0  ;;  %v1766_v12 = vshrl.u32 %v5688_v47, 16  ;;  %v5027_v47 = vld [vmem:[%s6216_s3 + $0x230] sm:$0xff]   ;;  %v5039_v43 = vld [vmem:[%s6217_s4 + $0x18] sm:$0xff]  }
 0x15e   : > { %4579 = vmatpush3.bf16.msra.mxu0 %v5005_v6  ;;  %4550 = vmatprep.subr.bf16.mxu1 %v5006_v21  ;;  %v1762_v22 = vor.u32 %v1760_v17, %v5723_v20  ;;  %v1744_v25 = vshll.u32 %v5783_v31, 16 }
 0x15f   : > { %4580 = vmatprep.subr.bf16.mxu0 %v5008_v27  ;;  %v1694_v14 = vor.u32 %v1693_v3, %v1689_v9  ;;  %v1698_v15 = vrot.slane %v1696_v4, 1  ;;  %v1723_v6 = vsel %vm426_vm0, %v1718_v8, %v1722_v11  ;;  %v1768_v21 = vor.u32 %v1766_v12, %v5718_v16 }
 0x160   : > { %v1739_v27 = vshll.u32 %v1643_v10, 16  ;;  %v1763_v16 = vshrl.u32 %v5740_v26, 16  ;;  %v1746_v29 = vrot.slane %v1744_v25, 1  ;;  %v5030_v26 = vld [vmem:[%s6216_s3 + $0x220] sm:$0xff]  }
 0x161   : > { %4551 = vmatpush3.bf16.msra.mxu1 %v5007_v24  ;;  %v1699_v18 = vsel %vm426_vm0, %v1694_v14, %v1698_v15  ;;  %v1737_v24 = vshrl.u32 %v1643_v10, 16 }
 0x162   : > { %4581 = vmatpush3.bf16.msra.mxu0 %v5009_v19  ;;  %4552 = vmatprep.subr.bf16.mxu1 %v5010_v62  ;;  %v1741_v23 = vrot.slane %v1739_v27, 1  ;;  %v1765_v19 = vor.u32 %v1763_v16, %v1722_v11  ;;  %v1757_v62 = vshrl.u32 %v1598_v55, 16 }
 0x163   : > { %4582 = vmatprep.subr.bf16.mxu0 %v5012_v28 }
 0x164   : > { %v1742_v28 = vor.u32 %v1741_v23, %v1737_v24  ;;  %v1759_v20 = vor.u32 %v1757_v62, %v1698_v15 }
 0x165   : > { %4553 = vmatpush3.bf16.msra.mxu1 %v5011_v51  ;;  %v5031_v51 = vld [vmem:[%s6216_s3 + $0x218] sm:$0xff]  }
 0x166   : > { %4583 = vmatpush3.bf16.msra.mxu0 %v5013_v34  ;;  %4554 = vmatprep.subr.bf16.mxu1 %v5014_v35  ;;  %v1747_v30 = vsel %vm426_vm0, %v1742_v28, %v1746_v29  ;;  %v5034_v34 = vld [vmem:[%s6216_s3 + $0x200] sm:$0xff]   ;;  %v1769_v35 = vshrl.u32 %v5783_v31, 16 }
 0x167   : > { %4584 = vmatprep.subr.bf16.mxu0 %v5016_v40  ;;  %v5036_v40 = vld [vmem:[%s6217_s4 + $0x30] sm:$0xff]  }
 0x168   : > { %v1771_v36 = vor.u32 %v1769_v35, %v1746_v29 }
 0x169   : > { %4555 = vmatpush3.bf16.msra.mxu1 %v5015_v44  ;;  %v5040_v44 = vld [vmem:[%s6217_s4 + $0x10] sm:$0xff]  }
 0x16a   : > { %4585 = vmatpush3.bf16.msra.mxu0 %v5017_v46  ;;  %4556 = vmatprep.subr.bf16.mxu1 %v5018_v50  ;;  %v5042_v46 = vld [vmem:[%s6217_s4] sm:$0xff]  }
 0x16b   : > { %4586 = vmatprep.subr.bf16.mxu0 %v5020_v48 }
 0x16d   : > { %4557 = vmatpush3.bf16.msra.mxu1 %v5019_v37 }
 0x16e   : > { %4587 = vmatpush3.bf16.msra.mxu0 %v5021_v57  ;;  %4558 = vmatprep.subr.bf16.mxu1 %v5022_v63 }
 0x16f   : > { %4792 = vmatprep.subr.bf16.mxu0 %v5035_v38 }
 0x171   : > { %4559 = vmatpush3.bf16.msra.mxu1 %v5023_v39  ;;  %2399 = vmatmul.mubr.bf16.vlgmr.msra.gmra.mxu0 %v1723_v6 }
 0x172   : > { %2406 = vmatprep.mubr.bf16.mxu0 %v1768_v21  ;;  %4772 = vmatprep.subr.bf16.mxu1 %v5026_v13 }
 0x173   : > { %4793 = vmatpush3.bf16.msra.mxu0 %v5035_v38 }
 0x174   : > { %2351 = vmatmul.mubr.bf16.vlgmr.msra.gmra.mxu1 %v1699_v18  ;;  %4794 = vmatprep.subr.bf16.mxu0 %v5036_v40 }
 0x175   : > { %2358 = vmatprep.mubr.bf16.mxu1 %v1762_v22  ;;  %4773 = vmatpush3.bf16.msra.mxu1 %v5026_v13 }
 0x176   : > { %4774 = vmatprep.subr.bf16.mxu1 %v5027_v47 }
 0x177   : > { %4795 = vmatpush3.bf16.msra.mxu0 %v5036_v40 }
 0x178   : > { %4796 = vmatprep.subr.bf16.mxu0 %v5037_v41 }
 0x179   : > { %4775 = vmatpush3.bf16.msra.mxu1 %v5027_v47  ;;  %2407 = vmatmul.mubr.bf16.gmra.mxu0 %v1765_v19 }
 0x17a   : > { %4776 = vmatprep.subr.bf16.mxu1 %v5028_v49 }
 0x17b   : > { %4797 = vmatpush3.bf16.msra.mxu0 %v5037_v41 }
 0x17c   : > { %2359 = vmatmul.mubr.bf16.gmra.mxu1 %v1759_v20  ;;  %4798 = vmatprep.subr.bf16.mxu0 %v5038_v42 }
 0x17d   : > { %4777 = vmatpush3.bf16.msra.mxu1 %v5028_v49  ;;  %4788 = vmatprep.mubr.bf16.mxu1 %v1747_v30 }
 0x17e   : > { %4778 = vmatprep.subr.bf16.mxu1 %v5030_v26 }
 0x17f   : > { %4799 = vmatpush3.bf16.msra.mxu0 %v5038_v42 }
 0x180   : > { %4800 = vmatprep.subr.bf16.mxu0 %v5039_v43 }
 0x181   : > { %4779 = vmatpush3.bf16.msra.mxu1 %v5030_v26 }
 0x182   : > { %4780 = vmatprep.subr.bf16.mxu1 %v5031_v51 }
 0x183   : > { %4801 = vmatpush3.bf16.msra.mxu0 %v5039_v43 }
 0x184   : > { %4802 = vmatprep.subr.bf16.mxu0 %v5040_v44 }
 0x185   : > { %4781 = vmatpush3.bf16.msra.mxu1 %v5031_v51 }
 0x186   : > { %4782 = vmatprep.subr.bf16.mxu1 %v5032_v33 }
 0x187   : > { %4803 = vmatpush3.bf16.msra.mxu0 %v5040_v44 }
 0x188   : > { %4804 = vmatprep.subr.bf16.mxu0 %v5041_v45 }
 0x189   : > { %4783 = vmatpush3.bf16.msra.mxu1 %v5032_v33 }
 0x18a   : > { %4784 = vmatprep.subr.bf16.mxu1 %v5033_v32 }
 0x18b   : > { %4805 = vmatpush3.bf16.msra.mxu0 %v5041_v45 }
 0x18c   : > { %4806 = vmatprep.subr.bf16.mxu0 %v5042_v46 }
 0x18d   : > { %4785 = vmatpush3.bf16.msra.mxu1 %v5033_v32 }
 0x18e   : > { %4786 = vmatprep.subr.bf16.mxu1 %v5034_v34 }
 0x18f   : > { %4807 = vmatpush3.bf16.msra.mxu0 %v5042_v46 }
 0x191   : > { %4787 = vmatpush3.bf16.msra.mxu1 %v5034_v34 }
 0x194   : > { %4789 = vmatmul.mubr.bf16.vlgmr.msra.gmra.mxu1 %v1771_v36 }
 0x210   : > { %v4532_v50 = vpop.f32.mrf.mxu0 }
 0x212   : > { %v4533_v48 = vpop.f32.mrf.mxu0 }
 0x213   : > { %v4534_v53 = vadd.f32 %v4533_v48, %v4532_v50 }
 0x214   : > { %v4504_v54 = vpop.f32.mrf.mxu1  ;;  %v4535_v55 = vpop.f32.mrf.mxu0 }
 0x216   : > { %v4505_v37 = vpop.f32.mrf.mxu1  ;;  %v4536_v56 = vpop.f32.mrf.mxu0 }
 0x217   : > { %v4506_v25 = vadd.f32 %v4505_v37, %v4504_v54  ;;  %v4537_v30 = vadd.f32 %v4536_v56, %v4535_v55 }
 0x218   : > { %v4507_v31 = vpop.f32.mrf.mxu1  ;;  %v4538_v57 = vpop.f32.mrf.mxu0 }
 0x219   : > { %v2305_v26 = vadd.f32 %v4534_v53, %v4506_v25  ;;  %v5068_v25 = vld [vmem:[%s6216_s3 + $0x2c8] sm:$0xff]  }
 0x21a   : > { %v4508_v63 = vpop.f32.mrf.mxu1  ;;  %v4539_v0 = vpop.f32.mrf.mxu0 }
 0x21b   : > { %v4540_v19 = vadd.f32 %v4539_v0, %v4538_v57  ;;  %v4509_v28 = vadd.f32 %v4508_v63, %v4507_v31  ;;  %v5043_v63 = vld [vmem:[%s6216_s3 + $0x338] sm:$0xff]  }
 0x21c   : > { %v4510_v2 = vpop.f32.mrf.mxu1  ;;  %v4541_v3 = vpop.f32.mrf.mxu0  ;;  %v5044_v0 = vld [vmem:[%s6216_s3 + $0x2f8] sm:$0xff]   ;;  %4648 = vmatprep.subr.bf16.mxu0 %v5043_v63 }
 0x21d   : > { %v2308_v32 = vadd.f32 %v4537_v30, %v4509_v28  ;;  %v5046_v3 = vld [vmem:[%s6216_s3 + $0x278] sm:$0xff]   ;;  %v5070_v28 = vld [vmem:[%s6216_s3 + $0x248] sm:$0xff]   ;;  %v5074_v30 = vld [vmem:[%s6216_s3 + $0x240] sm:$0xff]  }
 0x21e   : > { %v4511_v4 = vpop.f32.mrf.mxu1  ;;  %v4542_v8 = vpop.f32.mrf.mxu0 }
 0x21f   : > { %v4512_v24 = vadd.f32 %v4511_v4, %v4510_v2  ;;  %v5045_v2 = vld [vmem:[%s6216_s3 + $0x2b8] sm:$0xff]   ;;  %v5047_v4 = vld [vmem:[%s6216_s3 + $0x330] sm:$0xff]  }
 0x220   : > { %v4513_v39 = vpop.f32.mrf.mxu1  ;;  %4620 = vmatprep.subr.bf16.mxu1 %v5045_v2  ;;  %v5048_v8 = vld [vmem:[%s6216_s3 + $0x2f0] sm:$0xff]  }
 0x221   : > { %v2313_v29 = vadd.f32 %v4540_v19, %v4512_v24  ;;  %v5049_v39 = vld [vmem:[%s6216_s3 + $0x2b0] sm:$0xff]   ;;  %4621 = vmatpush3.bf16.msra.mxu1 %v5046_v3  ;;  %v5069_v19 = vld [vmem:[%s6216_s3 + $0x288] sm:$0xff]  }
 0x222   : > { %v4514_v9 = vpop.f32.mrf.mxu1  ;;  %4622 = vmatprep.subr.bf16.mxu1 %v5049_v39  ;;  %v5066_v24 = vld [vmem:[%s6216_s3 + $0x250] sm:$0xff]  }
 0x223   : > { %v5051_v9 = vld [vmem:[%s6216_s3 + $0x328] sm:$0xff]  }
 0x231   : > { %v4588_v10 = vpop.f32.mrf.mxu0 }
 0x233   : > { %v4589_v11 = vpop.f32.mrf.mxu0 }
 0x234   : > { %v4560_v12 = vpop.f32.mrf.mxu1  ;;  %v4590_v38 = vadd.f32 %v4589_v11, %v4588_v10  ;;  %v5050_v10 = vld [vmem:[%s6216_s3 + $0x270] sm:$0xff]   ;;  %v5052_v11 = vld [vmem:[%s6216_s3 + $0x2e8] sm:$0xff]  }
 0x235   : > { %v4591_v13 = vpop.f32.mrf.mxu0  ;;  %4623 = vmatpush3.bf16.msra.mxu1 %v5050_v10 }
 0x236   : > { %v4561_v14 = vpop.f32.mrf.mxu1 }
 0x237   : > { %v4592_v15 = vpop.f32.mrf.mxu0  ;;  %v4562_v20 = vadd.f32 %v4561_v14, %v4560_v12  ;;  %v5053_v12 = vld [vmem:[%s6216_s3 + $0x2a8] sm:$0xff]  }
 0x238   : > { %v4563_v6 = vpop.f32.mrf.mxu1  ;;  %v4593_v43 = vadd.f32 %v4592_v15, %v4591_v13  ;;  %v5055_v13 = vld [vmem:[%s6216_s3 + $0x320] sm:$0xff]   ;;  %v5054_v14 = vld [vmem:[%s6216_s3 + $0x268] sm:$0xff]   ;;  %4624 = vmatprep.subr.bf16.mxu1 %v5053_v12 }
 0x239   : > { %v4594_v21 = vpop.f32.mrf.mxu0  ;;  %v2353_v34 = vadd.f32 %v4562_v20, %v2305_v26  ;;  %v5056_v15 = vld [vmem:[%s6216_s3 + $0x2e0] sm:$0xff]   ;;  %4625 = vmatpush3.bf16.msra.mxu1 %v5054_v14  ;;  %v5078_v26 = vld [vmem:[%s6216_s3 + $0x438] sm:$0xff]  }
 0x23a   : > { %v4564_v27 = vpop.f32.mrf.mxu1  ;;  %v5072_v20 = vld [vmem:[%s6216_s3 + $0x2c0] sm:$0xff]  }
 0x23b   : > { %v4595_v17 = vpop.f32.mrf.mxu0  ;;  %v4565_v51 = vadd.f32 %v4564_v27, %v4563_v6  ;;  %v2401_v44 = vadd.f32 %v4590_v38, %v2353_v34  ;;  %v5057_v6 = vld [vmem:[%s6216_s3 + $0x2a0] sm:$0xff]  }
 0x23c   : > { %v4566_v47 = vpop.f32.mrf.mxu1  ;;  %v4596_v35 = vadd.f32 %v4595_v17, %v4594_v21  ;;  %v5059_v21 = vld [vmem:[%s6216_s3 + $0x318] sm:$0xff]   ;;  %v5058_v27 = vld [vmem:[%s6216_s3 + $0x260] sm:$0xff]   ;;  %4626 = vmatprep.subr.bf16.mxu1 %v5057_v6 }
 0x23d   : > { %v4597_v18 = vpop.f32.mrf.mxu0  ;;  %v2356_v40 = vadd.f32 %v4565_v51, %v2308_v32  ;;  %v5060_v17 = vld [vmem:[%s6216_s3 + $0x2d8] sm:$0xff]   ;;  %4627 = vmatpush3.bf16.msra.mxu1 %v5058_v27 }
 0x23e   : > { %v4567_v22 = vpop.f32.mrf.mxu1  ;;  %v5063_v18 = vld [vmem:[%s6216_s3 + $0x310] sm:$0xff]   ;;  %v5083_v51 = vld [vmem:[%s6216_s3 + $0x3b8] sm:$0xff]  }
 0x23f   : > { %v4598_v23 = vpop.f32.mrf.mxu0  ;;  %v4568_v62 = vadd.f32 %v4567_v22, %v4566_v47  ;;  %v2404_v48 = vadd.f32 %v4593_v43, %v2356_v40  ;;  %v5061_v47 = vld [vmem:[%s6216_s3 + $0x298] sm:$0xff]  }
 0x240   : > { %v4569_v16 = vpop.f32.mrf.mxu1  ;;  %v5062_v22 = vld [vmem:[%s6216_s3 + $0x258] sm:$0xff]   ;;  %4628 = vmatprep.subr.bf16.mxu1 %v5061_v47  ;;  %v5064_v23 = vld [vmem:[%s6216_s3 + $0x2d0] sm:$0xff]  }
 0x241   : > { %v2361_v33 = vadd.f32 %v4568_v62, %v2313_v29  ;;  %v5065_v16 = vld [vmem:[%s6216_s3 + $0x290] sm:$0xff]   ;;  %4629 = vmatpush3.bf16.msra.mxu1 %v5062_v22  ;;  %v5071_v62 = vld [vmem:[%s6216_s3 + $0x300] sm:$0xff]  }
 0x242   : > { %v4570_v49 = vpop.f32.mrf.mxu1  ;;  %4630 = vmatprep.subr.bf16.mxu1 %v5065_v16  ;;  %v5073_v29 = vld [vmem:[%s6216_s3 + $0x280] sm:$0xff]  }
 0x243   : > { %v2409_v41 = vadd.f32 %v4596_v35, %v2361_v33  ;;  %v5067_v49 = vld [vmem:[%s6216_s3 + $0x308] sm:$0xff]  }
 0x245   : > { %4631 = vmatpush3.bf16.msra.mxu1 %v5066_v24 }
 0x246   : > { %4632 = vmatprep.subr.bf16.mxu1 %v5069_v19 }
 0x249   : > { %4633 = vmatpush3.bf16.msra.mxu1 %v5070_v28 }
 0x24a   : > { %4634 = vmatprep.subr.bf16.mxu1 %v5073_v29  ;;  %v2762_v29 = vld [vmem:[#allocation2 + $0x10] sm:$0x7] }
 0x24d   : > { %4635 = vmatpush3.bf16.msra.mxu1 %v5074_v30 }
 0x24e   : > { %4676 = vmatprep.subr.bf16.mxu1 %v5083_v51 }
 0x254   : > { %v4790_v36 = vpop.f32.mrf.mxu1 }
 0x255   : > { %v2457_v45 = vadd.f32 %v4790_v36, %v2409_v41 }
 0x256   : > { %v2448_v42 = vpop.f32.mrf.mxu1 }
 0x257   : > { %v2449_v50 = vadd.f32 %v2448_v42, %v2401_v44  ;;  %v2464_v53 = vmax.f32 %v2457_v45, 0.0 }
 0x258   : > { %v4791_v46 = vpop.f32.mrf.mxu1 }
 0x259   : > { %v2462_v55 = vmax.f32 %v2449_v50, 0.0  ;;  %v2466_v57 = vpack.c.bf16 %v2464_v53, %v2464_v53  ;;  %v2753_v50 = vld [vmem:[#allocation2] sm:$0xe] }
 0x25a   : > { %v2451_v54 = vpop.f32.mrf.mxu1 }
 0x25b   : > { %v2452_v37 = vadd.f32 %v2451_v54, %v2404_v48  ;;  %v2755_v54 = vld [vmem:[#allocation2] sm:$0x8] }
 0x25d   : > { %v2463_v56 = vmax.f32 %v2452_v37, 0.0 }
 0x25f   : > { %v2465_v31 = vpack.c.bf16 %v2463_v56, %v2462_v55 }
 0x261   : > { %4808 = vmatprep.mubr.bf16.mxu0 %v2465_v31 }
 0x262   : > { %4809 = vmatmul.mubr.bf16.vlgmr.msra.gmra.mxu0 %v2466_v57 }
 0x263   : > { %4649 = vmatpush3.bf16.msra.mxu0 %v5044_v0 }
 0x264   : > { %4650 = vmatprep.subr.bf16.mxu0 %v5047_v4 }
 0x267   : > { %4651 = vmatpush3.bf16.msra.mxu0 %v5048_v8 }
 0x268   : > { %4652 = vmatprep.subr.bf16.mxu0 %v5051_v9 }
 0x26b   : > { %4653 = vmatpush3.bf16.msra.mxu0 %v5052_v11 }
 0x26c   : > { %4654 = vmatprep.subr.bf16.mxu0 %v5055_v13 }
 0x26f   : > { %4655 = vmatpush3.bf16.msra.mxu0 %v5056_v15 }
 0x270   : > { %4656 = vmatprep.subr.bf16.mxu0 %v5059_v21 }
 0x273   : > { %4657 = vmatpush3.bf16.msra.mxu0 %v5060_v17 }
 0x274   : > { %4658 = vmatprep.subr.bf16.mxu0 %v5063_v18 }
 0x277   : > { %4659 = vmatpush3.bf16.msra.mxu0 %v5064_v23 }
 0x278   : > { %4660 = vmatprep.subr.bf16.mxu0 %v5067_v49 }
 0x27b   : > { %4661 = vmatpush3.bf16.msra.mxu0 %v5068_v25 }
 0x27c   : > { %4662 = vmatprep.subr.bf16.mxu0 %v5071_v62 }
 0x27f   : > { %4663 = vmatpush3.bf16.msra.mxu0 %v5072_v20 }
 0x280   : > { %4704 = vmatprep.subr.bf16.mxu0 %v5078_v26 }
 0x322   : > { %v4810_v33 = vpop.f32.mrf.mxu0 }
 0x323   : > { %v5958_v34 = vadd.f32 %v4810_v33, %v5600_v58 }
 0x324   : > { %v2565_v32 = vpop.f32.mrf.mxu0 }
 0x325   : > { %v5961_v35 = vadd.f32 %v2565_v32, %v5607_v60  ;;  %v2584_v41 = vmax.f32 %v5958_v34, 0.0  ;;  %v5081_v32 = vld [vmem:[%s6216_s3 + $0x3f8] sm:$0xff]  }
 0x326   : > { %v4811_v36 = vpop.f32.mrf.mxu0 }
 0x327   : > { %v2582_v38 = vmax.f32 %v5961_v35, 0.0  ;;  %v2587_v58 = vmul.f32 %v2584_v41, %v1359_v1 }
 0x328   : > { %v2568_v40 = vpop.f32.mrf.mxu0 }
 0x329   : > { %v2585_v42 = vmul.f32 %v4347_v61, %v2582_v38  ;;  %v5968_v43 = vadd.f32 %v2568_v40, %v5615_v5  ;;  %v2749_v5 = vld [vmem:[#allocation2] sm:$0xf] }
 0x32b   : > { %v4339_v44 = vpack.c.bf16 %v2585_v42, %v2585_v42  ;;  %v2583_v45 = vmax.f32 %v5968_v43, 0.0 }
 0x32d   : > { %2601 = vst [vmem:[#allocation2 + $0x4] sm:$0xf] %v4339_v44  ;;  %v2586_v60 = vmul.f32 %v4348_v7, %v2583_v45 }
 0x32f   : > { %v4357_v46 = vpack.c.bf16 %v2587_v58, %v2586_v60  ;;  %v5086_v58 = vld [vmem:[%s6216_s3 + $0x430] sm:$0xff]  }
 0x331   : > { %4365 = vst [vmem:[#allocation2 + $0x8] sm:$0xff] %v4357_v46  }
 0x334   : > { %v5975_v48 = vld [vmem:[#allocation2 + $0x4] sm:$0xf] }
 0x335   : > { %v4223_v61 = vcombine.low %v2753_v50, %v5975_v48  ;;  %v4225_v37 = vcombine.low %v2755_v54, %v5975_v48  ;;  %v4221_v31 = vcombine.low %v2749_v5, %v5975_v48  ;;  %v2763_v14 = vld [vmem:[#allocation2 + $0x4] sm:$0x8]  ;;  %v2760_v50 = vld [vmem:[#allocation2 + $0x10] sm:$0x1] }
 0x336   : > { %v2757_v46 = vld [vmem:[#allocation2 + $0x4] sm:$0xf] }
 0x337   : > { %v2781_v53 = vshll.u32 %v4223_v61, 16  ;;  %v2805_v0 = vrot.slane %v4225_v37, 3  ;;  %v2796_v3 = vrot.slane %v4223_v61, 1  ;;  %v2779_v39 = vshrl.u32 %v4223_v61, 16 }
 0x338   : > { %v5979_v55 = vld [vmem:[#allocation2 + $0x8] sm:$0xf]  ;;  %v5981_v59 = vld [vmem:[#allocation2 + $0xc] sm:$0xf]  ;;  %v2873_v13 = vshll.u32 %v4221_v31, 16  ;;  %v2871_v41 = vshrl.u32 %v4221_v31, 16 }
 0x339   : > { %v2754_v1 = vld [vmem:[#allocation2 + $0xc] sm:$0x3]  ;;  %v4226_v52 = vcombine.low %v5979_v55, %v5981_v59  ;;  %v2783_v63 = vrot.slane %v2781_v53, 1  ;;  %v5990_v8 = vld [vmem:[#allocation2 + $0x8] sm:$0xf] }
 0x33a   : > { %v4224_v7 = vcombine.low %v5979_v55, %v2754_v1  ;;  %v2752_v56 = vld [vmem:[#allocation2 + $0xc] sm:$0x1]  ;;  %v5996_v27 = vcombine.low %v2763_v14, %v5990_v8  ;;  %v2875_v28 = vrot.slane %v2873_v13, 1  ;;  %v4229_v37 = vcombine.low %v2757_v46, %v5990_v8 }
 0x33b   : > { %v4222_v57 = vcombine.low %v5979_v55, %v2752_v56  ;;  %v2806_v2 = vrot.slane %v4226_v52, 3  ;;  %v2784_v21 = vor.u32 %v2783_v63, %v2779_v39  ;;  %v6002_v20 = vld [vmem:[#allocation2 + $0xc] sm:$0xf]  ;;  %v5085_v56 = vld [vmem:[%s6216_s3 + $0x378] sm:$0xff]   ;;  %v5088_v39 = vld [vmem:[%s6216_s3 + $0x3b0] sm:$0xff]  }
 0x33c   : > { %v5988_v4 = vrot.slane %v4224_v7, 1  ;;  %v6014_v60 = vcombine.low %v6002_v20, %v2762_v29  ;;  %v2848_v61 = vshrl.u32 %v5996_v27, 16  ;;  %v2851_v5 = vshll.u32 %v5996_v27, 16  ;;  %v5090_v14 = vld [vmem:[%s6216_s3 + $0x428] sm:$0xff]  }
 0x33d   : > { %v2786_v9 = vshll.u32 %v4222_v57, 16  ;;  %v2807_v10 = vsel %vm455_vm1, %v2805_v0, %v2806_v2  ;;  %v2910_v11 = vshll.u32 %v2806_v2, 16  ;;  %v2790_v22 = vshrl.u32 %v4222_v57, 16 }
 0x33e   : > { %v2798_v12 = vsel %vm445_vm2, %v2796_v3, %v5988_v4  ;;  %v2905_v15 = vshll.u32 %v2807_v10, 16  ;;  %v2898_v47 = vshll.u32 %v5988_v4, 16  ;;  %v2903_v23 = vshrl.u32 %v2807_v10, 16  ;;  %v5087_v3 = vld [vmem:[%s6216_s3 + $0x3f0] sm:$0xff]  }
 0x33f   : > { %v2893_v6 = vshll.u32 %v2798_v12, 16  ;;  %v2912_v17 = vrot.slane %v2910_v11, 1  ;;  %v2788_v18 = vrot.slane %v2786_v9, 1  ;;  %v2891_v49 = vshrl.u32 %v2798_v12, 16 }
 0x340   : > { %v2907_v16 = vrot.slane %v2905_v15, 1  ;;  %v2980_v62 = vshrl.u32 %v2806_v2, 16  ;;  %v2900_v51 = vrot.slane %v2898_v47, 1  ;;  %v2876_v1 = vor.u32 %v2875_v28, %v2871_v41  ;;  %v5089_v47 = vld [vmem:[%s6216_s3 + $0x370] sm:$0xff]  }
 0x341   : > { %v2895_v24 = vrot.slane %v2893_v6, 1  ;;  %v2789_v25 = vsel %vm426_vm0, %v2784_v21, %v2788_v18  ;;  %v6000_v19 = vor.u32 %v2790_v22, %v2788_v18  ;;  %v2856_v52 = vshrl.u32 %v6014_v60, 16  ;;  %v5091_v22 = vld [vmem:[%s6216_s3 + $0x3e8] sm:$0xff]  }
 0x342   : > { %v2908_v26 = vor.u32 %v2907_v16, %v2903_v23  ;;  %v2881_v33 = vshll.u32 %v2789_v25, 16  ;;  %v2879_v36 = vshrl.u32 %v2789_v25, 16  ;;  %v2982_v40 = vor.u32 %v2980_v62, %v2912_v17  ;;  %v5098_v62 = vld [vmem:[%s6216_s3 + $0x420] sm:$0xff]  }
 0x343   : > { %v2896_v30 = vor.u32 %v2895_v24, %v2891_v49  ;;  %v2886_v38 = vshll.u32 %v6000_v19, 16  ;;  %v2859_v7 = vshll.u32 %v6014_v60, 16  ;;  %v2974_v31 = vshrl.u32 %v6000_v19, 16 }
 0x344   : > { %v2913_v42 = vsel %vm426_vm0, %v2908_v26, %v2912_v17  ;;  %v2883_v45 = vrot.slane %v2881_v33, 1  ;;  %v2850_v57 = vrot.slane %v2848_v61, 2  ;;  %v2853_v63 = vrot.slane %v2851_v5, 3  ;;  %v5106_v61 = vld [vmem:[%s6216_s3 + $0x410] sm:$0xff]  }
 0x345   : > { %v2901_v44 = vsel %vm426_vm0, %v2896_v30, %v2900_v51  ;;  %3528 = vmatprep.mubr.bf16.mxu0 %v2913_v42  ;;  %v2888_v54 = vrot.slane %v2886_v38, 1  ;;  %v6026_v0 = vcombine.low %v6002_v20, %v2760_v50  ;;  %v2858_v9 = vrot.slane %v2856_v52, 2  ;;  %v2761_v30 = vld [vmem:[#allocation2 + $0x4] sm:$0xc] }
 0x346   : > { %3529 = vmatmul.mubr.bf16.vlgmr.msra.gmra.mxu0 %v2901_v44  ;;  %v2884_v53 = vor.u32 %v2883_v45, %v2879_v36  ;;  %v2861_v10 = vrot.slane %v2859_v7, 3  ;;  %v2929_v11 = vshll.u32 %v4229_v37, 16  ;;  %v2877_v12 = vsel %vm426_vm0, %v2876_v1, %v2788_v18  ;;  %v5107_v7 = vld [vmem:[%s6216_s3 + $0x3d0] sm:$0xff]  }
 0x347   : > { %4705 = vmatpush3.bf16.msra.mxu0 %v5081_v32  ;;  %3536 = vmatprep.mubr.bf16.mxu0 %v2982_v40  ;;  %v2976_v13 = vor.u32 %v2974_v31, %v2888_v54  ;;  %v2854_v15 = vor.u32 %v2853_v63, %v2850_v57  ;;  %v2977_v6 = vshrl.u32 %v5988_v4, 16  ;;  %v5092_v4 = vld [vmem:[%s6216_s3 + $0x3a8] sm:$0xff]   ;;  %v2927_v16 = vshrl.u32 %v4229_v37, 16  ;;  %v5100_v40 = vld [vmem:[%s6216_s3 + $0x3a0] sm:$0xff]   ;;  %v2764_v31 = vld [vmem:[#allocation2 + $0x10] sm:$0xf] }
 0x348   : > { %v2889_v2 = vsel %vm426_vm0, %v2884_v53, %v2888_v54  ;;  %4706 = vmatprep.subr.bf16.mxu0 %v5086_v58  ;;  %v6040_v21 = vor.u32 %v2861_v10, %v2858_v9  ;;  %v2931_v17 = vrot.slane %v2929_v11, 1  ;;  %v2934_v49 = vshll.u32 %v6026_v0, 16  ;;  %v5095_v32 = vld [vmem:[%s6216_s3 + $0x368] sm:$0xff]   ;;  %v5101_v58 = vld [vmem:[%s6216_s3 + $0x360] sm:$0xff]   ;;  %v5104_v54 = vld [vmem:[%s6216_s3 + $0x398] sm:$0xff]  }
 0x349   : > { %3480 = vmatprep.mubr.bf16.mxu1 %v2889_v2  ;;  %v2979_v18 = vor.u32 %v2977_v6, %v2900_v51  ;;  %v4227_v28 = vcombine.low %v5975_v48, %v5979_v55  ;;  %v4228_v29 = vcombine.low %v5981_v59, %v5981_v59  ;;  %v4231_v36 = vcombine.low %v2761_v30, %v5990_v8  ;;  %v5099_v48 = vld [vmem:[%s6216_s3 + $0x3e0] sm:$0xff]   ;;  %v5102_v8 = vld [vmem:[%s6216_s3 + $0x418] sm:$0xff]   ;;  %v5110_v57 = vld [vmem:[%s6216_s3 + $0x408] sm:$0xff]  }
 0x34a   : > { %3481 = vmatmul.mubr.bf16.vlgmr.msra.gmra.mxu1 %v2877_v12  ;;  %v2863_v23 = vsel %vm500_vm5, %v2854_v15, %v6040_v21  ;;  %v2958_v25 = vshll.u32 %v6040_v21, 16  ;;  %v2932_v26 = vor.u32 %v2931_v17, %v2927_v16  ;;  %v6066_v38 = vrot.slane %v2934_v49, 1  ;;  %v5111_v10 = vld [vmem:[%s6216_s3 + $0x3c8] sm:$0xff]   ;;  %v5114_v12 = vld [vmem:[%s6216_s3 + $0x400] sm:$0xff]  }
 0x34b   : > { %4677 = vmatpush3.bf16.msra.mxu1 %v5085_v56  ;;  %3488 = vmatprep.mubr.bf16.mxu1 %v2976_v13  ;;  %v2953_v24 = vshll.u32 %v2863_v23, 16  ;;  %v2951_v51 = vshrl.u32 %v2863_v23, 16  ;;  %v2811_v41 = vshrl.u32 %v4227_v28, 16  ;;  %v2818_v42 = vshrl.u32 %v4228_v29, 16  ;;  %v5108_v56 = vld [vmem:[%s6216_s3 + $0x390] sm:$0xff]   ;;  %v5112_v11 = vld [vmem:[%s6216_s3 + $0x388] sm:$0xff]  }
 0x34c   : > { %4707 = vmatpush3.bf16.msra.mxu0 %v5087_v3  ;;  %4678 = vmatprep.subr.bf16.mxu1 %v5088_v39  ;;  %v6071_v59 = vrot.slane %v2958_v25, 1  ;;  %v2937_v44 = vsel %vm426_vm0, %v2932_v26, %v6066_v38  ;;  %v2841_v46 = vrot.slane %v4231_v36, 2  ;;  %v6088_v50 = vrot.slane %v6014_v60, 2  ;;  %v5105_v60 = vld [vmem:[%s6216_s3 + $0x358] sm:$0xff]   ;;  %v5109_v39 = vld [vmem:[%s6216_s3 + $0x350] sm:$0xff]  }
 0x34d   : > { %4708 = vmatprep.subr.bf16.mxu0 %v5090_v14  ;;  %v2955_v33 = vrot.slane %v2953_v24, 1  ;;  %v2813_v5 = vrot.slane %v2811_v41, 7  ;;  %v2820_v37 = vrot.slane %v2818_v42, 7  ;;  %v2814_v1 = vshll.u32 %v4227_v28, 16 }
 0x34e   : > { %3537 = vmatmul.mubr.bf16.gmra.mxu0 %v2979_v18  ;;  %v2843_v53 = vsel %vm493_vm3, %v2841_v46, %v6088_v50  ;;  %v2821_v52 = vshll.u32 %v4228_v29, 16  ;;  %v4234_v9 = vcombine.low %v6002_v20, %v2764_v31  ;;  %v5113_v20 = vld [vmem:[%s6216_s3 + $0x348] sm:$0xff]   ;;  %v2867_v6 = vrot.slane %v5996_v27, 3  ;;  %v5116_v18 = vld [vmem:[%s6216_s3 + $0x380] sm:$0xff]   ;;  %v5120_v29 = vld [vmem:[%s6216_s3 + $0x478] sm:$0xff]  }
 0x34f   : > { %4679 = vmatpush3.bf16.msra.mxu1 %v5089_v47  ;;  %v2956_v55 = vor.u32 %v2955_v33, %v2951_v51  ;;  %v2816_v63 = vor.u32 %v2814_v1, %v2813_v5  ;;  %v2941_v2 = vshll.u32 %v2843_v53, 16  ;;  %v5115_v47 = vld [vmem:[%s6216_s3 + $0x3c0] sm:$0xff]   ;;  %v2992_v28 = vshrl.u32 %v6040_v21, 16  ;;  %v5121_v21 = vld [vmem:[%s6216_s3 + $0x470] sm:$0xff]  }
 0x350   : > { %4709 = vmatpush3.bf16.msra.mxu0 %v5091_v22  ;;  %4680 = vmatprep.subr.bf16.mxu1 %v5092_v4  ;;  %v2823_v3 = vor.u32 %v2821_v52, %v2820_v37  ;;  %v6131_v17 = vrot.slane %v4234_v9, 3  ;;  %v2939_v22 = vshrl.u32 %v2843_v53, 16  ;;  %v2946_v4 = vshll.u32 %v6088_v50, 16  ;;  %v5117_v27 = vld [vmem:[%s6216_s3 + $0x340] sm:$0xff]   ;;  %v5129_v53 = vld [vmem:[%s6217_s4 + $0x78] sm:$0xff]   ;;  %v5130_v1 = vld [vmem:[%s6217_s4 + $0x70] sm:$0xff]  }
 0x351   : > { %4710 = vmatprep.subr.bf16.mxu0 %v5098_v62  ;;  %v2961_v45 = vsel %vm426_vm0, %v2956_v55, %v6071_v59  ;;  %v2917_v13 = vshll.u32 %v2816_v63, 16  ;;  %v2943_v14 = vrot.slane %v2941_v2, 1  ;;  %v2915_v24 = vshrl.u32 %v2816_v63, 16  ;;  %v5124_v46 = vld [vmem:[%s6216_s3 + $0x460] sm:$0xff]   ;;  %v5131_v52 = vld [vmem:[%s6217_s4 + $0x68] sm:$0xff]   ;;  %v5134_v31 = vld [vmem:[%s6217_s4 + $0x50] sm:$0xff]  }
 0x352   : > { %3489 = vmatmul.mubr.bf16.gmra.mxu1 %v6000_v19  ;;  %3624 = vmatprep.mubr.bf16.mxu0 %v2961_v45  ;;  %v5103_v19 = vld [vmem:[%s6216_s3 + $0x3d8] sm:$0xff]   ;;  %v2824_v15 = vsel %vm461_vm4, %v2813_v5, %v2823_v3  ;;  %v2869_v25 = vsel %vm455_vm1, %v2867_v6, %v6131_v17  ;;  %v2948_v62 = vrot.slane %v2946_v4, 1  ;;  %v2994_v33 = vor.u32 %v2992_v28, %v6071_v59  ;;  %v5128_v5 = vld [vmem:[%s6216_s3 + $0x440] sm:$0xff]  }
 0x353   : > { %4681 = vmatpush3.bf16.msra.mxu1 %v5095_v32  ;;  %3576 = vmatprep.mubr.bf16.mxu1 %v2937_v44  ;;  %v2919_v23 = vrot.slane %v2917_v13, 1  ;;  %v2922_v16 = vshll.u32 %v2824_v15, 16  ;;  %v2944_v49 = vor.u32 %v2943_v14, %v2939_v22  ;;  %v2965_v32 = vshll.u32 %v2869_v25, 16  ;;  %v5136_v63 = vld [vmem:[%s6217_s4 + $0x40] sm:$0xff]  }
 0x354   : > { %4711 = vmatpush3.bf16.msra.mxu0 %v5099_v48  ;;  %4682 = vmatprep.subr.bf16.mxu1 %v5100_v40  ;;  %v2986_v36 = vshrl.u32 %v6026_v0, 16  ;;  %v2989_v59 = vshrl.u32 %v6088_v50, 16  ;;  %v5122_v0 = vld [vmem:[%s6216_s3 + $0x468] sm:$0xff]   ;;  %v2970_v41 = vshll.u32 %v6131_v17, 16  ;;  %v2983_v44 = vshrl.u32 %v2824_v15, 16 }
 0x355   : > { %4712 = vmatprep.subr.bf16.mxu0 %v5102_v8  ;;  %v2920_v26 = vor.u32 %v2919_v23, %v2915_v24  ;;  %v2924_v30 = vrot.slane %v2922_v16, 1  ;;  %v2949_v51 = vsel %vm426_vm0, %v2944_v49, %v2948_v62  ;;  %v2967_v40 = vrot.slane %v2965_v32, 1 }
 0x356   : > { %v2988_v55 = vor.u32 %v2986_v36, %v6066_v38  ;;  %v2963_v8 = vshrl.u32 %v2869_v25, 16  ;;  %v2991_v42 = vor.u32 %v2989_v59, %v2948_v62  ;;  %v2995_v37 = vshrl.u32 %v6131_v17, 16 }
 0x357   : > { %4683 = vmatpush3.bf16.msra.mxu1 %v5101_v58  ;;  %v2925_v48 = vsel %vm426_vm0, %v2920_v26, %v2924_v30  ;;  %v2985_v38 = vor.u32 %v2983_v44, %v2924_v30  ;;  %v2972_v58 = vrot.slane %v2970_v41, 1 }
 0x358   : > { %4713 = vmatpush3.bf16.msra.mxu0 %v5103_v19  ;;  %4684 = vmatprep.subr.bf16.mxu1 %v5104_v54  ;;  %v2968_v45 = vor.u32 %v2967_v40, %v2963_v8  ;;  %v5125_v19 = vld [vmem:[%s6216_s3 + $0x458] sm:$0xff]   ;;  %v5126_v54 = vld [vmem:[%s6216_s3 + $0x450] sm:$0xff]  }
 0x359   : > { %4714 = vmatprep.subr.bf16.mxu0 %v5106_v61  ;;  %v5127_v61 = vld [vmem:[%s6216_s3 + $0x448] sm:$0xff]  }
 0x35a   : > { %v2973_v50 = vsel %vm426_vm0, %v2968_v45, %v2972_v58 }
 0x35b   : > { %4685 = vmatpush3.bf16.msra.mxu1 %v5105_v60  ;;  %v2997_v60 = vor.u32 %v2995_v37, %v2972_v58 }
 0x35c   : > { %4715 = vmatpush3.bf16.msra.mxu0 %v5107_v7  ;;  %4686 = vmatprep.subr.bf16.mxu1 %v5108_v56  ;;  %v5132_v7 = vld [vmem:[%s6217_s4 + $0x60] sm:$0xff]   ;;  %v5133_v56 = vld [vmem:[%s6217_s4 + $0x58] sm:$0xff]  }
 0x35d   : > { %4716 = vmatprep.subr.bf16.mxu0 %v5110_v57  ;;  %v5135_v57 = vld [vmem:[%s6217_s4 + $0x48] sm:$0xff]  }
 0x35f   : > { %4687 = vmatpush3.bf16.msra.mxu1 %v5109_v39 }
 0x360   : > { %4717 = vmatpush3.bf16.msra.mxu0 %v5111_v10  ;;  %4688 = vmatprep.subr.bf16.mxu1 %v5112_v11 }
 0x361   : > { %4718 = vmatprep.subr.bf16.mxu0 %v5114_v12 }
 0x363   : > { %4689 = vmatpush3.bf16.msra.mxu1 %v5113_v20 }
 0x364   : > { %4719 = vmatpush3.bf16.msra.mxu0 %v5115_v47  ;;  %4690 = vmatprep.subr.bf16.mxu1 %v5116_v18 }
 0x365   : > { %4832 = vmatprep.subr.bf16.mxu0 %v5129_v53 }
 0x367   : > { %4691 = vmatpush3.bf16.msra.mxu1 %v5117_v27  ;;  %3625 = vmatmul.mubr.bf16.vlgmr.msra.gmra.mxu0 %v2949_v51 }
 0x368   : > { %3632 = vmatprep.mubr.bf16.mxu0 %v2994_v33  ;;  %4812 = vmatprep.subr.bf16.mxu1 %v5120_v29 }
 0x369   : > { %4833 = vmatpush3.bf16.msra.mxu0 %v5129_v53 }
 0x36a   : > { %3577 = vmatmul.mubr.bf16.vlgmr.msra.gmra.mxu1 %v2925_v48  ;;  %4834 = vmatprep.subr.bf16.mxu0 %v5130_v1 }
 0x36b   : > { %3584 = vmatprep.mubr.bf16.mxu1 %v2988_v55  ;;  %4813 = vmatpush3.bf16.msra.mxu1 %v5120_v29 }
 0x36c   : > { %4814 = vmatprep.subr.bf16.mxu1 %v5121_v21 }
 0x36d   : > { %4835 = vmatpush3.bf16.msra.mxu0 %v5130_v1 }
 0x36e   : > { %4836 = vmatprep.subr.bf16.mxu0 %v5131_v52 }
 0x36f   : > { %4815 = vmatpush3.bf16.msra.mxu1 %v5121_v21  ;;  %3633 = vmatmul.mubr.bf16.gmra.mxu0 %v2991_v42 }
 0x370   : > { %4816 = vmatprep.subr.bf16.mxu1 %v5122_v0 }
 0x371   : > { %4837 = vmatpush3.bf16.msra.mxu0 %v5131_v52 }
 0x372   : > { %3585 = vmatmul.mubr.bf16.gmra.mxu1 %v2985_v38  ;;  %4838 = vmatprep.subr.bf16.mxu0 %v5132_v7 }
 0x373   : > { %4817 = vmatpush3.bf16.msra.mxu1 %v5122_v0  ;;  %4828 = vmatprep.mubr.bf16.mxu1 %v2973_v50 }
 0x374   : > { %4818 = vmatprep.subr.bf16.mxu1 %v5124_v46 }
 0x375   : > { %4839 = vmatpush3.bf16.msra.mxu0 %v5132_v7 }
 0x376   : > { %4840 = vmatprep.subr.bf16.mxu0 %v5133_v56 }
 0x377   : > { %4819 = vmatpush3.bf16.msra.mxu1 %v5124_v46 }
 0x378   : > { %4820 = vmatprep.subr.bf16.mxu1 %v5125_v19 }
 0x379   : > { %4841 = vmatpush3.bf16.msra.mxu0 %v5133_v56 }
 0x37a   : > { %4842 = vmatprep.subr.bf16.mxu0 %v5134_v31 }
 0x37b   : > { %4821 = vmatpush3.bf16.msra.mxu1 %v5125_v19 }
 0x37c   : > { %4822 = vmatprep.subr.bf16.mxu1 %v5126_v54 }
 0x37d   : > { %4843 = vmatpush3.bf16.msra.mxu0 %v5134_v31 }
 0x37e   : > { %4844 = vmatprep.subr.bf16.mxu0 %v5135_v57 }
 0x37f   : > { %4823 = vmatpush3.bf16.msra.mxu1 %v5126_v54 }
 0x380   : > { %4824 = vmatprep.subr.bf16.mxu1 %v5127_v61 }
 0x381   : > { %4845 = vmatpush3.bf16.msra.mxu0 %v5135_v57 }
 0x382   : > { %4846 = vmatprep.subr.bf16.mxu0 %v5136_v63 }
 0x383   : > { %4825 = vmatpush3.bf16.msra.mxu1 %v5127_v61 }
 0x384   : > { %4826 = vmatprep.subr.bf16.mxu1 %v5128_v5 }
 0x385   : > { %4847 = vmatpush3.bf16.msra.mxu0 %v5136_v63 }
 0x387   : > { %4827 = vmatpush3.bf16.msra.mxu1 %v5128_v5 }
 0x38a   : > { %4829 = vmatmul.mubr.bf16.vlgmr.msra.gmra.mxu1 %v2997_v60 }
 0x406   : > { %v4664_v2 = vpop.f32.mrf.mxu0 }
 0x408   : > { %v4665_v3 = vpop.f32.mrf.mxu0 }
 0x409   : > { %v4666_v39 = vadd.f32 %v4665_v3, %v4664_v2 }
 0x40a   : > { %v4636_v9 = vpop.f32.mrf.mxu1  ;;  %v4667_v10 = vpop.f32.mrf.mxu0 }
 0x40c   : > { %v4637_v11 = vpop.f32.mrf.mxu1  ;;  %v4668_v12 = vpop.f32.mrf.mxu0 }
 0x40d   : > { %v4638_v55 = vadd.f32 %v4637_v11, %v4636_v9  ;;  %v4669_v44 = vadd.f32 %v4668_v12, %v4667_v10 }
 0x40e   : > { %v4639_v13 = vpop.f32.mrf.mxu1  ;;  %v4670_v14 = vpop.f32.mrf.mxu0 }
 0x40f   : > { %v3531_v42 = vadd.f32 %v4666_v39, %v4638_v55 }
 0x410   : > { %v4640_v15 = vpop.f32.mrf.mxu1  ;;  %v4671_v20 = vpop.f32.mrf.mxu0 }
 0x411   : > { %v4672_v40 = vadd.f32 %v4671_v20, %v4670_v14  ;;  %v4641_v0 = vadd.f32 %v4640_v15, %v4639_v13 }
 0x412   : > { %v4642_v6 = vpop.f32.mrf.mxu1  ;;  %v4673_v17 = vpop.f32.mrf.mxu0 }
 0x413   : > { %v3534_v58 = vadd.f32 %v4669_v44, %v4641_v0 }
 0x414   : > { %v4643_v47 = vpop.f32.mrf.mxu1  ;;  %v4674_v18 = vpop.f32.mrf.mxu0 }
 0x415   : > { %v4644_v48 = vadd.f32 %v4643_v47, %v4642_v6 }
 0x416   : > { %v4645_v22 = vpop.f32.mrf.mxu1 }
 0x417   : > { %v3539_v41 = vadd.f32 %v4672_v40, %v4644_v48 }
 0x418   : > { %v4646_v4 = vpop.f32.mrf.mxu1 }
 0x427   : > { %v4720_v23 = vpop.f32.mrf.mxu0 }
 0x429   : > { %v4721_v16 = vpop.f32.mrf.mxu0 }
 0x42a   : > { %v4692_v49 = vpop.f32.mrf.mxu1  ;;  %v4722_v54 = vadd.f32 %v4721_v16, %v4720_v23 }
 0x42b   : > { %v4723_v27 = vpop.f32.mrf.mxu0 }
 0x42c   : > { %v4693_v24 = vpop.f32.mrf.mxu1 }
 0x42d   : > { %v4724_v25 = vpop.f32.mrf.mxu0  ;;  %v4694_v8 = vadd.f32 %v4693_v24, %v4692_v49 }
 0x42e   : > { %v4695_v62 = vpop.f32.mrf.mxu1  ;;  %v4725_v60 = vadd.f32 %v4724_v25, %v4723_v27 }
 0x42f   : > { %v4726_v28 = vpop.f32.mrf.mxu0  ;;  %v3579_v46 = vadd.f32 %v4694_v8, %v3531_v42 }
 0x430   : > { %v4696_v29 = vpop.f32.mrf.mxu1 }
 0x431   : > { %v4727_v26 = vpop.f32.mrf.mxu0  ;;  %v4697_v45 = vadd.f32 %v4696_v29, %v4695_v62  ;;  %v3627_v53 = vadd.f32 %v4722_v54, %v3579_v46 }
 0x432   : > { %v4698_v30 = vpop.f32.mrf.mxu1  ;;  %v4728_v50 = vadd.f32 %v4727_v26, %v4726_v28 }
 0x433   : > { %v4729_v51 = vpop.f32.mrf.mxu0  ;;  %v3582_v61 = vadd.f32 %v4697_v45, %v3534_v58 }
 0x434   : > { %v4699_v33 = vpop.f32.mrf.mxu1 }
 0x435   : > { %v4730_v32 = vpop.f32.mrf.mxu0  ;;  %v4700_v59 = vadd.f32 %v4699_v33, %v4698_v30  ;;  %v3630_v56 = vadd.f32 %v4725_v60, %v3582_v61 }
 0x436   : > { %v4701_v36 = vpop.f32.mrf.mxu1 }
 0x437   : > { %v3587_v38 = vadd.f32 %v4700_v59, %v3539_v41 }
 0x438   : > { %v4702_v21 = vpop.f32.mrf.mxu1 }
 0x439   : > { %v3635_v5 = vadd.f32 %v4728_v50, %v3587_v38 }
 0x44a   : > { %v4830_v19 = vpop.f32.mrf.mxu1 }
 0x44b   : > { %v3683_v1 = vadd.f32 %v4830_v19, %v3635_v5 }
 0x44c   : > { %v3674_v37 = vpop.f32.mrf.mxu1 }
 0x44d   : > { %v3675_v7 = vadd.f32 %v3674_v37, %v3627_v53  ;;  %v3690_v63 = vmax.f32 %v3683_v1, 0.0 }
 0x44e   : > { %v4831_v52 = vpop.f32.mrf.mxu1 }
 0x44f   : > { %v3688_v2 = vmax.f32 %v3675_v7, 0.0  ;;  %v3692_v9 = vpack.c.bf16 %v3690_v63, %v3690_v63 }
 0x450   : > { %v3677_v31 = vpop.f32.mrf.mxu1 }
 0x451   : > { %v3678_v57 = vadd.f32 %v3677_v31, %v3630_v56 }
 0x453   : > { %v3689_v3 = vmax.f32 %v3678_v57, 0.0 }
 0x455   : > { %v3691_v39 = vpack.c.bf16 %v3689_v3, %v3688_v2 }
 0x457   : > { %4848 = vmatprep.mubr.bf16.mxu0 %v3691_v39 }
 0x458   : > { %4849 = vmatmul.mubr.bf16.vlgmr.msra.gmra.mxu0 %v3692_v9 }
 0x518   : > { %v4850_v10 = vpop.f32.mrf.mxu0 }
 0x519   : > { %v3808_v11 = vadd.f32 %v4850_v10, %v5958_v34 }
 0x51a   : > { %v3792_v12 = vpop.f32.mrf.mxu0 }
 0x51b   : > { %v3811_v13 = vmax.f32 %v3808_v11, 0.0  ;;  %v3806_v20 = vadd.f32 %v3792_v12, %v5961_v35 }
 0x51c   : > { %v4851_v14 = vpop.f32.mrf.mxu0 }
 0x51d   : > { %v4344_v15 = vpack.c.bf16 %v3811_v13, %v3811_v13  ;;  %v3809_v47 = vmax.f32 %v3806_v20, 0.0 }
 0x51e   : > { %v3795_v6 = vpop.f32.mrf.mxu0 }
 0x51f   : > { %3827 = vst [vmem:[%s251_s17 + $0x8] sm:$0xf] %v4344_v15  ;;  %v3807_v17 = vadd.f32 %v3795_v6, %v5968_v43 }
 0x521   : > { %v3810_v18 = vmax.f32 %v3807_v17, 0.0 }
 0x523   : > { %v4362_v22 = vpack.c.bf16 %v3810_v18, %v3809_v47 }
 0x525   : > { %4363 = vst [vmem:[%s251_s17] sm:$0xff] %v4362_v22  }
 0x526 PF: > { %s16_s21 = sadd.s32 1, %s5143_s21  }
 0x527   : > { %p13_p4 = scmp.ge.s32.totalorder %s16_s21, 4  }
 0x529   :  { %15 = sbr.rel (!%p13_p4) target bundleno = 1 (0x1), region = 76 }

</bundles_post_ra>
